<compile_context>
chip_gen: v7x
topology: tpu7x:2x2x1
jax: 0.10.0
libtpu: 0.0.40
codegen_flags: <defaults>
</compile_context>

<pallas_src>
import functools
import math

import jax
import jax.numpy as jnp
from jax.experimental import pallas as pl


def _round_up(v, m):
    return ((v + m - 1) // m) * m


def _full_spec(shape):
    zeros = (0,) * len(shape)
    return pl.BlockSpec(shape, lambda *_: zeros)


def _sigmoid(x):
    # One EUP tanh instead of exp + divide.
    return 0.5 * jnp.tanh(0.5 * x) + 0.5


def _pad_mask(npad, fpad, n_valid, f_valid):
    row = jax.lax.broadcasted_iota(jnp.int32, (npad, fpad), 0)
    col = jax.lax.broadcasted_iota(jnp.int32, (npad, fpad), 1)
    return (row < n_valid) & (col < f_valid)


# ---------------------------------------------------------------------------
# Kernels
# ---------------------------------------------------------------------------
def gc_layer_kernel(*refs, batch, n_valid, f_valid, has_bias, has_bn,
                    activation, apply_mask):
    """One GraphConvolution (+ folded eval-BN + activation) on padded operands."""
    it = iter(refs)
    x_ref = next(it)
    adj_ref = next(it)
    w_ref = next(it)
    b_ref = next(it) if has_bias else None
    s_ref = next(it) if has_bn else None
    h_ref = next(it) if has_bn else None
    o_ref = next(it)

    adj = adj_ref[...]
    w = w_ref[...]
    x = x_ref[...]
    npad = adj.shape[0]
    fpad = w.shape[1]

    # Per-batch adj @ x[b] stacked, then ONE (B*Npad, Fin) @ (Fin, Fpad) MXU matmul
    # for the batch-shared weight (B+1 matmul sequences total).
    ax = jnp.concatenate(
        [jnp.dot(adj, x[bi], preferred_element_type=jnp.float32)
         for bi in range(batch)], axis=0).astype(w.dtype)
    y = jnp.dot(ax, w, preferred_element_type=jnp.float32)
    y = y.reshape(batch, npad, fpad)                      # f32 epilogue

    if has_bias:
        y = y + b_ref[...]                                # (1, Fpad) broadcast
    if has_bn:
        y = y * s_ref[...] + h_ref[...]                   # folded eval BatchNorm1d
    if activation == "relu":
        y = jnp.maximum(y, 0.0)
    elif activation == "sigmoid":
        y = _sigmoid(y)
    if apply_mask:
        # Keep padded node rows / feature lanes exactly zero in the padded layout.
        y = jnp.where(_pad_mask(npad, fpad, n_valid, f_valid), y, 0.0)
    o_ref[...] = y.astype(o_ref.dtype)                    # lane-dense stores


def gc_block_kernel(x_ref, adj1_ref, w1_ref, s1_ref, h1_ref,
                    adj2_ref, w2_ref, s2_ref, h2_ref, o_ref,
                    *, batch, n_valid, f_valid, apply_mask):
    """Fused GC_Block: gc1 + bn1 + relu + gc2 + bn2 + relu + residual, one call."""
    npad = adj1_ref.shape[0]
    fpad = w1_ref.shape[1]
    cdt = w1_ref.dtype

    x_full = x_ref[...]                                   # compute dtype (e.g. bf16)

    def layer(x_list, adj_ref, w_ref, s_ref, h_ref):
        adj = adj_ref[...]
        w = w_ref[...]
        ax = jnp.concatenate(
            [jnp.dot(adj, xb, preferred_element_type=jnp.float32)
             for xb in x_list], axis=0).astype(cdt)
        y = jnp.dot(ax, w, preferred_element_type=jnp.float32)
        y = y.reshape(batch, npad, fpad)
        y = y * s_ref[...] + h_ref[...]                   # eval BN (GC bias folded in)
        return jnp.maximum(y, 0.0)                        # ReLU; eval Dropout == identity

    y1 = layer([x_full[bi] for bi in range(batch)],
               adj1_ref, w1_ref, s1_ref, h1_ref).astype(cdt)
    y2 = layer([y1[bi] for bi in range(batch)],
               adj2_ref, w2_ref, s2_ref, h2_ref)
    out = y2 + x_full.astype(jnp.float32)                 # residual
    if apply_mask:
        out = jnp.where(_pad_mask(npad, fpad, n_valid, f_valid), out, 0.0)
    o_ref[...] = out.astype(o_ref.dtype)


# ---------------------------------------------------------------------------
# One-time parameter prep (pad + cast ONCE, not per call)
# ---------------------------------------------------------------------------
def prep_gc_params(weight, adj, bias=None, bn_scale=None, bn_shift=None, *,
                   npad, fin_pad, fout_pad, compute_dtype=jnp.bfloat16):
    """Pad GraphConvolution (+ optional folded eval BatchNorm) parameters once."""
    fin, fout = weight.shape
    n = adj.shape[0]
    w_p = jnp.zeros((fin_pad, fout_pad), compute_dtype).at[:fin, :fout].set(
        weight.astype(compute_dtype))
    adj_p = jnp.zeros((npad, npad), compute_dtype).at[:n, :n].set(
        adj.astype(compute_dtype))
    b_p = s_p = h_p = None
    if bn_scale is not None:
        scale = bn_scale.reshape(n, fout).astype(jnp.float32)
        shift = bn_shift.reshape(n, fout).astype(jnp.float32)
        if bias is not None:                       # fold GC bias into the BN shift
            shift = shift + bias[None, :].astype(jnp.float32) * scale
        s_p = jnp.zeros((npad, fout_pad), jnp.float32).at[:n, :fout].set(scale)
        h_p = jnp.zeros((npad, fout_pad), jnp.float32).at[:n, :fout].set(shift)
    elif bias is not None:
        b_p = jnp.zeros((1, fout_pad), jnp.float32).at[0, :fout].set(
            bias.astype(jnp.float32))
    return dict(adj=adj_p, w=w_p, bias=b_p, scale=s_p, shift=h_p,
                n_valid=n, f_valid=fout)


def to_padded(x, npad, fpad, dtype=None):
    """Stack entry: pad + cast ONCE; stay in the padded layout afterwards."""
    B, n, f = x.shape
    dtype = dtype or x.dtype
    return jnp.zeros((B, npad, fpad), dtype).at[:, :n, :f].set(x.astype(dtype))


def from_padded(x_pad, n, f):
    """Stack exit: slice ONCE."""
    return x_pad[:, :n, :f]


# ---------------------------------------------------------------------------
# Wrappers (grid=(): single fused step; no per-call pad/slice)
# ---------------------------------------------------------------------------
def graph_conv_padded(x_pad, params, *, activation=None, out_dtype=None):
    B, npad, fin_pad = x_pad.shape
    adj_p, w_p = params["adj"], params["w"]
    b_p, s_p, h_p = params["bias"], params["scale"], params["shift"]
    n_valid, f_valid = params["n_valid"], params["f_valid"]
    fpad = w_p.shape[1]
    has_bias = b_p is not None
    has_bn = s_p is not None
    out_dtype = out_dtype or x_pad.dtype
    apply_mask = (npad > n_valid) or (fpad > f_valid)

    operands = [x_pad.astype(w_p.dtype), adj_p, w_p]
    in_specs = [_full_spec((B, npad, fin_pad)),
                _full_spec((npad, npad)),
                _full_spec((fin_pad, fpad))]
    if has_bias:
        operands.append(b_p)
        in_specs.append(_full_spec((1, fpad)))
    if has_bn:
        operands += [s_p, h_p]
        in_specs += [_full_spec((npad, fpad)), _full_spec((npad, fpad))]

    flops = 2 * B * (npad * npad * fin_pad + npad * fin_pad * fpad)
    bytes_accessed = int(sum(o.size * o.dtype.itemsize for o in operands)
                         + B * npad * fpad * jnp.dtype(out_dtype).itemsize)
    trans = B * npad * fpad if activation == "sigmoid" else 0

    return pl.pallas_call(
        functools.partial(gc_layer_kernel, batch=B, n_valid=n_valid,
                          f_valid=f_valid, has_bias=has_bias, has_bn=has_bn,
                          activation=activation, apply_mask=apply_mask),
        out_shape=jax.ShapeDtypeStruct((B, npad, fpad), out_dtype),
        in_specs=in_specs,
        out_specs=_full_spec((B, npad, fpad)),
        cost_estimate=pl.CostEstimate(flops=flops, transcendentals=trans,
                                      bytes_accessed=bytes_accessed),
    )(*operands)


def gc_block_padded(x_pad, p1, p2, *, out_dtype=None):
    """Fused GC_Block forward on padded activations (eval-mode BN/dropout)."""
    B, npad, fpad = x_pad.shape
    out_dtype = out_dtype or x_pad.dtype
    n_valid, f_valid = p1["n_valid"], p1["f_valid"]
    apply_mask = (npad > n_valid) or (fpad > f_valid)
    operands = [x_pad.astype(p1["w"].dtype),
                p1["adj"], p1["w"], p1["scale"], p1["shift"],
                p2["adj"], p2["w"], p2["scale"], p2["shift"]]
    in_specs = [_full_spec(o.shape) for o in operands]
    flops = 2 * 2 * B * (npad * npad * fpad + npad * fpad * fpad)
    bytes_accessed = int(sum(o.size * o.dtype.itemsize for o in operands)
                         + B * npad * fpad * jnp.dtype(out_dtype).itemsize)
    return pl.pallas_call(
        functools.partial(gc_block_kernel, batch=B, n_valid=n_valid,
                          f_valid=f_valid, apply_mask=apply_mask),
        out_shape=jax.ShapeDtypeStruct((B, npad, fpad), out_dtype),
        in_specs=in_specs,
        out_specs=_full_spec((B, npad, fpad)),
        cost_estimate=pl.CostEstimate(flops=flops, transcendentals=0,
                                      bytes_accessed=bytes_accessed),
    )(*operands)


# ---------------------------------------------------------------------------
# Demo / validation
# ---------------------------------------------------------------------------
if __name__ == "__main__":
    # Module defaults: node_n=57, input_feature=25, hidden_feature=128; batch=2.
    batch, node_n, in_f, hidden = 2, 57, 25, 128
    npad = _round_up(node_n, 8)        # 64: unmasked sublane tiles
    fin_pad = _round_up(in_f, 128)     # 128: lane-dense inputs
    hid_pad = _round_up(hidden, 128)   # 128
    out_pad = _round_up(in_f, 128)     # gcout head: hidden -> 25
    att_pad = _round_up(1, 128)        # gcatt head: hidden -> 1

    key = jax.random.PRNGKey(0)
    kit = iter(jax.random.split(key, 24))

    def gc_init(fin, fout):
        stdv = 1.0 / math.sqrt(fout)   # matches reset_parameters()
        w = jax.random.uniform(next(kit), (fin, fout), minval=-stdv, maxval=stdv,
                               dtype=jnp.float32)
        a = jax.random.uniform(next(kit), (node_n, node_n), minval=-stdv,
                               maxval=stdv, dtype=jnp.float32)
        b = jax.random.uniform(next(kit), (fout,), minval=-stdv, maxval=stdv,
                               dtype=jnp.float32)
        return w, a, b

    def bn_init(f):
        s = 1.0 + 0.1 * jax.random.normal(next(kit), (node_n * f,), dtype=jnp.float32)
        h = 0.1 * jax.random.normal(next(kit), (node_n * f,), dtype=jnp.float32)
        return s, h

    x = jax.random.normal(next(kit), (batch, node_n, in_f), dtype=jnp.float32)

    w_in, a_in, b_in = gc_init(in_f, hidden)
    s_in, h_in = bn_init(hidden)                 # bn1 (eval-mode affine)
    w_b1, a_b1, b_b1 = gc_init(hidden, hidden)   # GC_Block.gc1
    s_b1, h_b1 = bn_init(hidden)
    w_b2, a_b2, b_b2 = gc_init(hidden, hidden)   # GC_Block.gc2
    s_b2, h_b2 = bn_init(hidden)
    w_oc, a_oc, b_oc = gc_init(hidden, in_f)     # gcout-style head
    w_at, a_at, b_at = gc_init(hidden, 1)        # gcatt head (+ sigmoid)

    def run_forward(compute_dtype):
        # Pad parameters ONCE.
        p_in = prep_gc_params(w_in, a_in, b_in, s_in, h_in, npad=npad,
                              fin_pad=fin_pad, fout_pad=hid_pad,
                              compute_dtype=compute_dtype)
        p_b1 = prep_gc_params(w_b1, a_b1, b_b1, s_b1, h_b1, npad=npad,
                              fin_pad=hid_pad, fout_pad=hid_pad,
                              compute_dtype=compute_dtype)
        p_b2 = prep_gc_params(w_b2, a_b2, b_b2, s_b2, h_b2, npad=npad,
                              fin_pad=hid_pad, fout_pad=hid_pad,
                              compute_dtype=compute_dtype)
        p_oc = prep_gc_params(w_oc, a_oc, b_oc, npad=npad,
                              fin_pad=hid_pad, fout_pad=out_pad,
                              compute_dtype=compute_dtype)
        p_at = prep_gc_params(w_at, a_at, b_at, npad=npad,
                              fin_pad=hid_pad, fout_pad=att_pad,
                              compute_dtype=compute_dtype)

        @jax.jit
        def fwd(xin):
            xp = to_padded(xin, npad, fin_pad, dtype=compute_dtype)   # pad once
            y = graph_conv_padded(xp, p_in, activation="relu",
                                  out_dtype=compute_dtype)            # gcin+bn1+relu
            y = gc_block_padded(y, p_b1, p_b2, out_dtype=compute_dtype)  # gcbs fused
            out_corr = graph_conv_padded(y, p_oc, activation=None,
                                         out_dtype=jnp.float32)       # gcout head
            att = graph_conv_padded(y, p_at, activation="sigmoid",
                                    out_dtype=jnp.float32)            # gcatt head
            return (from_padded(out_corr, node_n, in_f),              # slice once
                    from_padded(att, node_n, 1))
        return fwd(x)

    def reference(compute_dtype):
        c = lambda v: v.astype(compute_dtype)
        f32 = jnp.float32

        def gc(xc, w, a, b):
            ax = jnp.einsum("nm,bmf->bnf", c(a), c(xc), preferred_element_type=f32)
            y = jnp.einsum("bnf,fo->bno", c(ax), c(w), preferred_element_type=f32)
            return y + b[None, None, :]

        s_in2, h_in2 = s_in.reshape(node_n, hidden), h_in.reshape(node_n, hidden)
        s_b12, h_b12 = s_b1.reshape(node_n, hidden), h_b1.reshape(node_n, hidden)
        s_b22, h_b22 = s_b2.reshape(node_n, hidden), h_b2.reshape(node_n, hidden)

        y1 = jnp.maximum(gc(c(x), w_in, a_in, b_in) * s_in2 + h_in2, 0.0)
        y1c = c(y1)
        z1 = jnp.maximum(gc(y1c, w_b1, a_b1, b_b1) * s_b12 + h_b12, 0.0)
        z2 = jnp.maximum(gc(c(z1), w_b2, a_b2, b_b2) * s_b22 + h_b22, 0.0)
        y2 = z2 + y1c.astype(f32)
        y2c = c(y2)
        out_corr = gc(y2c, w_oc, a_oc, b_oc)
        att = jax.nn.sigmoid(gc(y2c, w_at, a_at, b_at))
        return out_corr, att

    # f32 path: matches the module's exact semantics.
    oc32, at32 = run_forward(jnp.float32)
    jax.block_until_ready((oc32, at32))
    oc_r32, at_r32 = reference(jnp.float32)
    assert oc32.shape == (batch, node_n, in_f) and at32.shape == (batch, node_n, 1)
    assert jnp.allclose(oc32, oc_r32, atol=2e-3, rtol=2e-2)
    assert jnp.allclose(at32, at_r32, atol=2e-3, rtol=2e-2)

    # bf16 MXU path (per perf review): validate against a reference with the same
    # bf16 casts and f32 accumulation.
    ocbf, atbf = run_forward(jnp.bfloat16)
    jax.block_until_ready((ocbf, atbf))
    oc_rbf, at_rbf = reference(jnp.bfloat16)
    assert jnp.allclose(ocbf, oc_rbf, atol=2e-3, rtol=2e-2)
    assert jnp.allclose(atbf, at_rbf, atol=2e-3, rtol=2e-2)

    print("KERNEL_OK")
</pallas_src>

<mosaic_0001>
module attributes {stable_mosaic.version = 11 : i64} {
  func.func @gc_layer_kernel(%arg0: memref<2x64x128xf32, #tpu.memory_space<vmem>>, %arg1: memref<64x64xf32, #tpu.memory_space<vmem>>, %arg2: memref<128x128xf32, #tpu.memory_space<vmem>>, %arg3: memref<64x128xf32, #tpu.memory_space<vmem>>, %arg4: memref<64x128xf32, #tpu.memory_space<vmem>>, %arg5: memref<2x64x128xf32, #tpu.memory_space<vmem>>) attributes {dimension_semantics = [], scalar_prefetch = 0 : i64, scratch_operands = 0 : i64, tpu.core_type = #tpu.core_type<tc>} {
    %c0 = arith.constant 0 : index
    %c0_0 = arith.constant 0 : index
    %0 = vector.load %arg1[%c0, %c0_0] : memref<64x64xf32, #tpu.memory_space<vmem>>, vector<64x64xf32>
    %c0_1 = arith.constant 0 : index
    %c0_2 = arith.constant 0 : index
    %1 = vector.load %arg2[%c0_1, %c0_2] : memref<128x128xf32, #tpu.memory_space<vmem>>, vector<128x128xf32>
    %c0_3 = arith.constant 0 : index
    %c0_4 = arith.constant 0 : index
    %c0_5 = arith.constant 0 : index
    %2 = vector.load %arg0[%c0_3, %c0_4, %c0_5] : memref<2x64x128xf32, #tpu.memory_space<vmem>>, vector<2x64x128xf32>
    %3 = vector.extract_strided_slice %2 {offsets = [0, 0, 0], sizes = [1, 64, 128], strides = [1, 1, 1]} : vector<2x64x128xf32> to vector<1x64x128xf32>
    %4 = vector.shape_cast %3 : vector<1x64x128xf32> to vector<64x128xf32>
    %cst = arith.constant dense<0.000000e+00> : vector<64x128xf32>
    %5 = tpu.matmul %0, %4, %cst {dimension_numbers = #tpu.dot_dimension_numbers<[1], [0], [0], [1], [0, 0, 1, 1], [], []>} : vector<64x64xf32>, vector<64x128xf32>, vector<64x128xf32> -> vector<64x128xf32>
    %6 = vector.extract_strided_slice %2 {offsets = [1, 0, 0], sizes = [1, 64, 128], strides = [1, 1, 1]} : vector<2x64x128xf32> to vector<1x64x128xf32>
    %7 = vector.shape_cast %6 : vector<1x64x128xf32> to vector<64x128xf32>
    %cst_6 = arith.constant dense<0.000000e+00> : vector<64x128xf32>
    %8 = tpu.matmul %0, %7, %cst_6 {dimension_numbers = #tpu.dot_dimension_numbers<[1], [0], [0], [1], [0, 0, 1, 1], [], []>} : vector<64x64xf32>, vector<64x128xf32>, vector<64x128xf32> -> vector<64x128xf32>
    %9 = tpu.concatenate %5, %8 in 0 : vector<64x128xf32>, vector<64x128xf32> -> vector<128x128xf32>
    %cst_7 = arith.constant dense<0.000000e+00> : vector<128x128xf32>
    %10 = tpu.matmul %9, %1, %cst_7 {dimension_numbers = #tpu.dot_dimension_numbers<[1], [0], [0], [1], [0, 0, 1, 1], [], []>} : vector<128x128xf32>, vector<128x128xf32>, vector<128x128xf32> -> vector<128x128xf32>
    %11 = vector.shape_cast %10 : vector<128x128xf32> to vector<2x64x128xf32>
    %c0_8 = arith.constant 0 : index
    %c0_9 = arith.constant 0 : index
    %12 = vector.load %arg3[%c0_8, %c0_9] : memref<64x128xf32, #tpu.memory_space<vmem>>, vector<64x128xf32>
    %13 = vector.shape_cast %12 : vector<64x128xf32> to vector<1x64x128xf32>
    %14 = vector.broadcast %13 : vector<1x64x128xf32> to vector<2x64x128xf32>
    %15 = arith.mulf %11, %14 : vector<2x64x128xf32>
    %c0_10 = arith.constant 0 : index
    %c0_11 = arith.constant 0 : index
    %16 = vector.load %arg4[%c0_10, %c0_11] : memref<64x128xf32, #tpu.memory_space<vmem>>, vector<64x128xf32>
    %17 = vector.shape_cast %16 : vector<64x128xf32> to vector<1x64x128xf32>
    %18 = vector.broadcast %17 : vector<1x64x128xf32> to vector<2x64x128xf32>
    %19 = arith.addf %15, %18 : vector<2x64x128xf32>
    %cst_12 = arith.constant 0.000000e+00 : f32
    %20 = vector.broadcast %cst_12 : f32 to vector<2x64x128xf32>
    %21 = arith.maximumf %19, %20 : vector<2x64x128xf32>
    %22 = tpu.iota {dimensions = array<i32: 0>} : vector<64x128xi32>
    %23 = tpu.iota {dimensions = array<i32: 1>} : vector<64x128xi32>
    %c57_i32 = arith.constant 57 : i32
    %24 = vector.broadcast %c57_i32 : i32 to vector<64x128xi32>
    %25 = arith.cmpi slt, %22, %24 : vector<64x128xi32>
    %c128_i32 = arith.constant 128 : i32
    %26 = vector.broadcast %c128_i32 : i32 to vector<64x128xi32>
    %27 = arith.cmpi slt, %23, %26 : vector<64x128xi32>
    %28 = arith.andi %25, %27 : vector<64x128xi1>
    %cst_13 = arith.constant 0.000000e+00 : f32
    %29 = vector.shape_cast %28 : vector<64x128xi1> to vector<1x64x128xi1>
    %30 = vector.broadcast %29 : vector<1x64x128xi1> to vector<2x64x128xi1>
    %31 = vector.broadcast %cst_13 : f32 to vector<2x64x128xf32>
    %32 = arith.select %30, %21, %31 : vector<2x64x128xi1>, vector<2x64x128xf32>
    %c0_14 = arith.constant 0 : index
    %c0_15 = arith.constant 0 : index
    %c0_16 = arith.constant 0 : index
    %33 = vector.load %arg5[%c0_14, %c0_15, %c0_16] : memref<2x64x128xf32, #tpu.memory_space<vmem>>, vector<2x64x128xf32>
    tpu.vector_store %arg5[%c0_14, %c0_15, %c0_16], %32 {strides = array<i32>} : memref<2x64x128xf32, #tpu.memory_space<vmem>>, vector<2x64x128xf32>,
    return
  }
}

module attributes {stable_mosaic.version = 11 : i64} {
  func.func @gc_block_kernel(%arg0: memref<2x64x128xf32, #tpu.memory_space<vmem>>, %arg1: memref<64x64xf32, #tpu.memory_space<vmem>>, %arg2: memref<128x128xf32, #tpu.memory_space<vmem>>, %arg3: memref<64x128xf32, #tpu.memory_space<vmem>>, %arg4: memref<64x128xf32, #tpu.memory_space<vmem>>, %arg5: memref<64x64xf32, #tpu.memory_space<vmem>>, %arg6: memref<128x128xf32, #tpu.memory_space<vmem>>, %arg7: memref<64x128xf32, #tpu.memory_space<vmem>>, %arg8: memref<64x128xf32, #tpu.memory_space<vmem>>, %arg9: memref<2x64x128xf32, #tpu.memory_space<vmem>>) attributes {dimension_semantics = [], scalar_prefetch = 0 : i64, scratch_operands = 0 : i64, tpu.core_type = #tpu.core_type<tc>} {
    %c0 = arith.constant 0 : index
    %c0_0 = arith.constant 0 : index
    %c0_1 = arith.constant 0 : index
    %0 = vector.load %arg0[%c0, %c0_0, %c0_1] : memref<2x64x128xf32, #tpu.memory_space<vmem>>, vector<2x64x128xf32>
    %1 = vector.extract_strided_slice %0 {offsets = [0, 0, 0], sizes = [1, 64, 128], strides = [1, 1, 1]} : vector<2x64x128xf32> to vector<1x64x128xf32>
    %2 = vector.shape_cast %1 : vector<1x64x128xf32> to vector<64x128xf32>
    %3 = vector.extract_strided_slice %0 {offsets = [1, 0, 0], sizes = [1, 64, 128], strides = [1, 1, 1]} : vector<2x64x128xf32> to vector<1x64x128xf32>
    %4 = vector.shape_cast %3 : vector<1x64x128xf32> to vector<64x128xf32>
    %c0_2 = arith.constant 0 : index
    %c0_3 = arith.constant 0 : index
    %5 = vector.load %arg1[%c0_2, %c0_3] : memref<64x64xf32, #tpu.memory_space<vmem>>, vector<64x64xf32>
    %c0_4 = arith.constant 0 : index
    %c0_5 = arith.constant 0 : index
    %6 = vector.load %arg2[%c0_4, %c0_5] : memref<128x128xf32, #tpu.memory_space<vmem>>, vector<128x128xf32>
    %cst = arith.constant dense<0.000000e+00> : vector<64x128xf32>
    %7 = tpu.matmul %5, %2, %cst {dimension_numbers = #tpu.dot_dimension_numbers<[1], [0], [0], [1], [0, 0, 1, 1], [], []>} : vector<64x64xf32>, vector<64x128xf32>, vector<64x128xf32> -> vector<64x128xf32>
    %cst_6 = arith.constant dense<0.000000e+00> : vector<64x128xf32>
    %8 = tpu.matmul %5, %4, %cst_6 {dimension_numbers = #tpu.dot_dimension_numbers<[1], [0], [0], [1], [0, 0, 1, 1], [], []>} : vector<64x64xf32>, vector<64x128xf32>, vector<64x128xf32> -> vector<64x128xf32>
    %9 = tpu.concatenate %7, %8 in 0 : vector<64x128xf32>, vector<64x128xf32> -> vector<128x128xf32>
    %cst_7 = arith.constant dense<0.000000e+00> : vector<128x128xf32>
    %10 = tpu.matmul %9, %6, %cst_7 {dimension_numbers = #tpu.dot_dimension_numbers<[1], [0], [0], [1], [0, 0, 1, 1], [], []>} : vector<128x128xf32>, vector<128x128xf32>, vector<128x128xf32> -> vector<128x128xf32>
    %11 = vector.shape_cast %10 : vector<128x128xf32> to vector<2x64x128xf32>
    %c0_8 = arith.constant 0 : index
    %c0_9 = arith.constant 0 : index
    %12 = vector.load %arg3[%c0_8, %c0_9] : memref<64x128xf32, #tpu.memory_space<vmem>>, vector<64x128xf32>
    %13 = vector.shape_cast %12 : vector<64x128xf32> to vector<1x64x128xf32>
    %14 = vector.broadcast %13 : vector<1x64x128xf32> to vector<2x64x128xf32>
    %15 = arith.mulf %11, %14 : vector<2x64x128xf32>
    %c0_10 = arith.constant 0 : index
    %c0_11 = arith.constant 0 : index
    %16 = vector.load %arg4[%c0_10, %c0_11] : memref<64x128xf32, #tpu.memory_space<vmem>>, vector<64x128xf32>
    %17 = vector.shape_cast %16 : vector<64x128xf32> to vector<1x64x128xf32>
    %18 = vector.broadcast %17 : vector<1x64x128xf32> to vector<2x64x128xf32>
    %19 = arith.addf %15, %18 : vector<2x64x128xf32>
    %cst_12 = arith.constant 0.000000e+00 : f32
    %20 = vector.broadcast %cst_12 : f32 to vector<2x64x128xf32>
    %21 = arith.maximumf %19, %20 : vector<2x64x128xf32>
    %22 = vector.extract_strided_slice %21 {offsets = [0, 0, 0], sizes = [1, 64, 128], strides = [1, 1, 1]} : vector<2x64x128xf32> to vector<1x64x128xf32>
    %23 = vector.shape_cast %22 : vector<1x64x128xf32> to vector<64x128xf32>
    %24 = vector.extract_strided_slice %21 {offsets = [1, 0, 0], sizes = [1, 64, 128], strides = [1, 1, 1]} : vector<2x64x128xf32> to vector<1x64x128xf32>
    %25 = vector.shape_cast %24 : vector<1x64x128xf32> to vector<64x128xf32>
    %c0_13 = arith.constant 0 : index
    %c0_14 = arith.constant 0 : index
    %26 = vector.load %arg5[%c0_13, %c0_14] : memref<64x64xf32, #tpu.memory_space<vmem>>, vector<64x64xf32>
    %c0_15 = arith.constant 0 : index
    %c0_16 = arith.constant 0 : index
    %27 = vector.load %arg6[%c0_15, %c0_16] : memref<128x128xf32, #tpu.memory_space<vmem>>, vector<128x128xf32>
    %cst_17 = arith.constant dense<0.000000e+00> : vector<64x128xf32>
    %28 = tpu.matmul %26, %23, %cst_17 {dimension_numbers = #tpu.dot_dimension_numbers<[1], [0], [0], [1], [0, 0, 1, 1], [], []>} : vector<64x64xf32>, vector<64x128xf32>, vector<64x128xf32> -> vector<64x128xf32>
    %cst_18 = arith.constant dense<0.000000e+00> : vector<64x128xf32>
    %29 = tpu.matmul %26, %25, %cst_18 {dimension_numbers = #tpu.dot_dimension_numbers<[1], [0], [0], [1], [0, 0, 1, 1], [], []>} : vector<64x64xf32>, vector<64x128xf32>, vector<64x128xf32> -> vector<64x128xf32>
    %30 = tpu.concatenate %28, %29 in 0 : vector<64x128xf32>, vector<64x128xf32> -> vector<128x128xf32>
    %cst_19 = arith.constant dense<0.000000e+00> : vector<128x128xf32>
    %31 = tpu.matmul %30, %27, %cst_19 {dimension_numbers = #tpu.dot_dimension_numbers<[1], [0], [0], [1], [0, 0, 1, 1], [], []>} : vector<128x128xf32>, vector<128x128xf32>, vector<128x128xf32> -> vector<128x128xf32>
    %32 = vector.shape_cast %31 : vector<128x128xf32> to vector<2x64x128xf32>
    %c0_20 = arith.constant 0 : index
    %c0_21 = arith.constant 0 : index
    %33 = vector.load %arg7[%c0_20, %c0_21] : memref<64x128xf32, #tpu.memory_space<vmem>>, vector<64x128xf32>
    %34 = vector.shape_cast %33 : vector<64x128xf32> to vector<1x64x128xf32>
    %35 = vector.broadcast %34 : vector<1x64x128xf32> to vector<2x64x128xf32>
    %36 = arith.mulf %32, %35 : vector<2x64x128xf32>
    %c0_22 = arith.constant 0 : index
    %c0_23 = arith.constant 0 : index
    %37 = vector.load %arg8[%c0_22, %c0_23] : memref<64x128xf32, #tpu.memory_space<vmem>>, vector<64x128xf32>
    %38 = vector.shape_cast %37 : vector<64x128xf32> to vector<1x64x128xf32>
    %39 = vector.broadcast %38 : vector<1x64x128xf32> to vector<2x64x128xf32>
    %40 = arith.addf %36, %39 : vector<2x64x128xf32>
    %cst_24 = arith.constant 0.000000e+00 : f32
    %41 = vector.broadcast %cst_24 : f32 to vector<2x64x128xf32>
    %42 = arith.maximumf %40, %41 : vector<2x64x128xf32>
    %43 = arith.addf %42, %0 : vector<2x64x128xf32>
    %44 = tpu.iota {dimensions = array<i32: 0>} : vector<64x128xi32>
    %45 = tpu.iota {dimensions = array<i32: 1>} : vector<64x128xi32>
    %c57_i32 = arith.constant 57 : i32
    %46 = vector.broadcast %c57_i32 : i32 to vector<64x128xi32>
    %47 = arith.cmpi slt, %44, %46 : vector<64x128xi32>
    %c128_i32 = arith.constant 128 : i32
    %48 = vector.broadcast %c128_i32 : i32 to vector<64x128xi32>
    %49 = arith.cmpi slt, %45, %48 : vector<64x128xi32>
    %50 = arith.andi %47, %49 : vector<64x128xi1>
    %cst_25 = arith.constant 0.000000e+00 : f32
    %51 = vector.shape_cast %50 : vector<64x128xi1> to vector<1x64x128xi1>
    %52 = vector.broadcast %51 : vector<1x64x128xi1> to vector<2x64x128xi1>
    %53 = vector.broadcast %cst_25 : f32 to vector<2x64x128xf32>
    %54 = arith.select %52, %43, %53 : vector<2x64x128xi1>, vector<2x64x128xf32>
    %c0_26 = arith.constant 0 : index
    %c0_27 = arith.constant 0 : index
    %c0_28 = arith.constant 0 : index
    %55 = vector.load %arg9[%c0_26, %c0_27, %c0_28] : memref<2x64x128xf32, #tpu.memory_space<vmem>>, vector<2x64x128xf32>
    tpu.vector_store %arg9[%c0_26, %c0_27, %c0_28], %54 {strides = array<i32>} : memref<2x64x128xf32, #tpu.memory_space<vmem>>, vector<2x64x128xf32>,
    return
  }
}

module attributes {stable_mosaic.version = 11 : i64} {
  func.func @gc_layer_kernel(%arg0: memref<2x64x128xf32, #tpu.memory_space<vmem>>, %arg1: memref<64x64xf32, #tpu.memory_space<vmem>>, %arg2: memref<128x128xf32, #tpu.memory_space<vmem>>, %arg3: memref<1x128xf32, #tpu.memory_space<vmem>>, %arg4: memref<2x64x128xf32, #tpu.memory_space<vmem>>) attributes {dimension_semantics = [], scalar_prefetch = 0 : i64, scratch_operands = 0 : i64, tpu.core_type = #tpu.core_type<tc>} {
    %c0 = arith.constant 0 : index
    %c0_0 = arith.constant 0 : index
    %0 = vector.load %arg1[%c0, %c0_0] : memref<64x64xf32, #tpu.memory_space<vmem>>, vector<64x64xf32>
    %c0_1 = arith.constant 0 : index
    %c0_2 = arith.constant 0 : index
    %1 = vector.load %arg2[%c0_1, %c0_2] : memref<128x128xf32, #tpu.memory_space<vmem>>, vector<128x128xf32>
    %c0_3 = arith.constant 0 : index
    %c0_4 = arith.constant 0 : index
    %c0_5 = arith.constant 0 : index
    %2 = vector.load %arg0[%c0_3, %c0_4, %c0_5] : memref<2x64x128xf32, #tpu.memory_space<vmem>>, vector<2x64x128xf32>
    %3 = vector.extract_strided_slice %2 {offsets = [0, 0, 0], sizes = [1, 64, 128], strides = [1, 1, 1]} : vector<2x64x128xf32> to vector<1x64x128xf32>
    %4 = vector.shape_cast %3 : vector<1x64x128xf32> to vector<64x128xf32>
    %cst = arith.constant dense<0.000000e+00> : vector<64x128xf32>
    %5 = tpu.matmul %0, %4, %cst {dimension_numbers = #tpu.dot_dimension_numbers<[1], [0], [0], [1], [0, 0, 1, 1], [], []>} : vector<64x64xf32>, vector<64x128xf32>, vector<64x128xf32> -> vector<64x128xf32>
    %6 = vector.extract_strided_slice %2 {offsets = [1, 0, 0], sizes = [1, 64, 128], strides = [1, 1, 1]} : vector<2x64x128xf32> to vector<1x64x128xf32>
    %7 = vector.shape_cast %6 : vector<1x64x128xf32> to vector<64x128xf32>
    %cst_6 = arith.constant dense<0.000000e+00> : vector<64x128xf32>
    %8 = tpu.matmul %0, %7, %cst_6 {dimension_numbers = #tpu.dot_dimension_numbers<[1], [0], [0], [1], [0, 0, 1, 1], [], []>} : vector<64x64xf32>, vector<64x128xf32>, vector<64x128xf32> -> vector<64x128xf32>
    %9 = tpu.concatenate %5, %8 in 0 : vector<64x128xf32>, vector<64x128xf32> -> vector<128x128xf32>
    %cst_7 = arith.constant dense<0.000000e+00> : vector<128x128xf32>
    %10 = tpu.matmul %9, %1, %cst_7 {dimension_numbers = #tpu.dot_dimension_numbers<[1], [0], [0], [1], [0, 0, 1, 1], [], []>} : vector<128x128xf32>, vector<128x128xf32>, vector<128x128xf32> -> vector<128x128xf32>
    %11 = vector.shape_cast %10 : vector<128x128xf32> to vector<2x64x128xf32>
    %c0_8 = arith.constant 0 : index
    %c0_9 = arith.constant 0 : index
    %12 = vector.load %arg3[%c0_8, %c0_9] : memref<1x128xf32, #tpu.memory_space<vmem>>, vector<1x128xf32>
    %13 = vector.shape_cast %12 : vector<1x128xf32> to vector<1x1x128xf32>
    %14 = vector.broadcast %13 : vector<1x1x128xf32> to vector<2x64x128xf32>
    %15 = arith.addf %11, %14 : vector<2x64x128xf32>
    %16 = tpu.iota {dimensions = array<i32: 0>} : vector<64x128xi32>
    %17 = tpu.iota {dimensions = array<i32: 1>} : vector<64x128xi32>
    %c57_i32 = arith.constant 57 : i32
    %18 = vector.broadcast %c57_i32 : i32 to vector<64x128xi32>
    %19 = arith.cmpi slt, %16, %18 : vector<64x128xi32>
    %c25_i32 = arith.constant 25 : i32
    %20 = vector.broadcast %c25_i32 : i32 to vector<64x128xi32>
    %21 = arith.cmpi slt, %17, %20 : vector<64x128xi32>
    %22 = arith.andi %19, %21 : vector<64x128xi1>
    %cst_10 = arith.constant 0.000000e+00 : f32
    %23 = vector.shape_cast %22 : vector<64x128xi1> to vector<1x64x128xi1>
    %24 = vector.broadcast %23 : vector<1x64x128xi1> to vector<2x64x128xi1>
    %25 = vector.broadcast %cst_10 : f32 to vector<2x64x128xf32>
    %26 = arith.select %24, %15, %25 : vector<2x64x128xi1>, vector<2x64x128xf32>
    %c0_11 = arith.constant 0 : index
    %c0_12 = arith.constant 0 : index
    %c0_13 = arith.constant 0 : index
    %27 = vector.load %arg4[%c0_11, %c0_12, %c0_13] : memref<2x64x128xf32, #tpu.memory_space<vmem>>, vector<2x64x128xf32>
    tpu.vector_store %arg4[%c0_11, %c0_12, %c0_13], %26 {strides = array<i32>} : memref<2x64x128xf32, #tpu.memory_space<vmem>>, vector<2x64x128xf32>,
    return
  }
}

module attributes {stable_mosaic.version = 11 : i64} {
  func.func @gc_layer_kernel(%arg0: memref<2x64x128xf32, #tpu.memory_space<vmem>>, %arg1: memref<64x64xf32, #tpu.memory_space<vmem>>, %arg2: memref<128x128xf32, #tpu.memory_space<vmem>>, %arg3: memref<1x128xf32, #tpu.memory_space<vmem>>, %arg4: memref<2x64x128xf32, #tpu.memory_space<vmem>>) attributes {dimension_semantics = [], scalar_prefetch = 0 : i64, scratch_operands = 0 : i64, tpu.core_type = #tpu.core_type<tc>} {
    %c0 = arith.constant 0 : index
    %c0_0 = arith.constant 0 : index
    %0 = vector.load %arg1[%c0, %c0_0] : memref<64x64xf32, #tpu.memory_space<vmem>>, vector<64x64xf32>
    %c0_1 = arith.constant 0 : index
    %c0_2 = arith.constant 0 : index
    %1 = vector.load %arg2[%c0_1, %c0_2] : memref<128x128xf32, #tpu.memory_space<vmem>>, vector<128x128xf32>
    %c0_3 = arith.constant 0 : index
    %c0_4 = arith.constant 0 : index
    %c0_5 = arith.constant 0 : index
    %2 = vector.load %arg0[%c0_3, %c0_4, %c0_5] : memref<2x64x128xf32, #tpu.memory_space<vmem>>, vector<2x64x128xf32>
    %3 = vector.extract_strided_slice %2 {offsets = [0, 0, 0], sizes = [1, 64, 128], strides = [1, 1, 1]} : vector<2x64x128xf32> to vector<1x64x128xf32>
    %4 = vector.shape_cast %3 : vector<1x64x128xf32> to vector<64x128xf32>
    %cst = arith.constant dense<0.000000e+00> : vector<64x128xf32>
    %5 = tpu.matmul %0, %4, %cst {dimension_numbers = #tpu.dot_dimension_numbers<[1], [0], [0], [1], [0, 0, 1, 1], [], []>} : vector<64x64xf32>, vector<64x128xf32>, vector<64x128xf32> -> vector<64x128xf32>
    %6 = vector.extract_strided_slice %2 {offsets = [1, 0, 0], sizes = [1, 64, 128], strides = [1, 1, 1]} : vector<2x64x128xf32> to vector<1x64x128xf32>
    %7 = vector.shape_cast %6 : vector<1x64x128xf32> to vector<64x128xf32>
    %cst_6 = arith.constant dense<0.000000e+00> : vector<64x128xf32>
    %8 = tpu.matmul %0, %7, %cst_6 {dimension_numbers = #tpu.dot_dimension_numbers<[1], [0], [0], [1], [0, 0, 1, 1], [], []>} : vector<64x64xf32>, vector<64x128xf32>, vector<64x128xf32> -> vector<64x128xf32>
    %9 = tpu.concatenate %5, %8 in 0 : vector<64x128xf32>, vector<64x128xf32> -> vector<128x128xf32>
    %cst_7 = arith.constant dense<0.000000e+00> : vector<128x128xf32>
    %10 = tpu.matmul %9, %1, %cst_7 {dimension_numbers = #tpu.dot_dimension_numbers<[1], [0], [0], [1], [0, 0, 1, 1], [], []>} : vector<128x128xf32>, vector<128x128xf32>, vector<128x128xf32> -> vector<128x128xf32>
    %11 = vector.shape_cast %10 : vector<128x128xf32> to vector<2x64x128xf32>
    %c0_8 = arith.constant 0 : index
    %c0_9 = arith.constant 0 : index
    %12 = vector.load %arg3[%c0_8, %c0_9] : memref<1x128xf32, #tpu.memory_space<vmem>>, vector<1x128xf32>
    %13 = vector.shape_cast %12 : vector<1x128xf32> to vector<1x1x128xf32>
    %14 = vector.broadcast %13 : vector<1x1x128xf32> to vector<2x64x128xf32>
    %15 = arith.addf %11, %14 : vector<2x64x128xf32>
    %cst_10 = arith.constant 5.000000e-01 : f32
    %16 = vector.broadcast %cst_10 : f32 to vector<2x64x128xf32>
    %17 = arith.mulf %16, %15 : vector<2x64x128xf32>
    %18 = math.tanh %17 : vector<2x64x128xf32>
    %cst_11 = arith.constant 5.000000e-01 : f32
    %19 = vector.broadcast %cst_11 : f32 to vector<2x64x128xf32>
    %20 = arith.mulf %19, %18 : vector<2x64x128xf32>
    %cst_12 = arith.constant 5.000000e-01 : f32
    %21 = vector.broadcast %cst_12 : f32 to vector<2x64x128xf32>
    %22 = arith.addf %20, %21 : vector<2x64x128xf32>
    %23 = tpu.iota {dimensions = array<i32: 0>} : vector<64x128xi32>
    %24 = tpu.iota {dimensions = array<i32: 1>} : vector<64x128xi32>
    %c57_i32 = arith.constant 57 : i32
    %25 = vector.broadcast %c57_i32 : i32 to vector<64x128xi32>
    %26 = arith.cmpi slt, %23, %25 : vector<64x128xi32>
    %c1_i32 = arith.constant 1 : i32
    %27 = vector.broadcast %c1_i32 : i32 to vector<64x128xi32>
    %28 = arith.cmpi slt, %24, %27 : vector<64x128xi32>
    %29 = arith.andi %26, %28 : vector<64x128xi1>
    %cst_13 = arith.constant 0.000000e+00 : f32
    %30 = vector.shape_cast %29 : vector<64x128xi1> to vector<1x64x128xi1>
    %31 = vector.broadcast %30 : vector<1x64x128xi1> to vector<2x64x128xi1>
    %32 = vector.broadcast %cst_13 : f32 to vector<2x64x128xf32>
    %33 = arith.select %31, %22, %32 : vector<2x64x128xi1>, vector<2x64x128xf32>
    %c0_14 = arith.constant 0 : index
    %c0_15 = arith.constant 0 : index
    %c0_16 = arith.constant 0 : index
    %34 = vector.load %arg4[%c0_14, %c0_15, %c0_16] : memref<2x64x128xf32, #tpu.memory_space<vmem>>, vector<2x64x128xf32>
    tpu.vector_store %arg4[%c0_14, %c0_15, %c0_16], %33 {strides = array<i32>} : memref<2x64x128xf32, #tpu.memory_space<vmem>>, vector<2x64x128xf32>,
    return
  }
}

</mosaic_0001>

<bundles_post_ra>
// kernel: fwd.4
= control target key start
LH: loop header
LB: loop body
LE: loop exit
PB: predicated region body
PF: predicated region fallthrough
CT: control target
= control target key end

     0   :  { %vm60_vm0 = vcmask 523264   ;;  %s1112_s0 = inlined_call_operand.vmem [shape: f32[2,64,128], index: 0, kind: input, shape index: {}]   ;;  %s1113_s1 = inlined_call_operand.vmem [shape: f32[64,64], index: 1, kind: input, shape index: {}]   ;;  %s1114_s2 = inlined_call_operand.vmem [shape: f32[128,128], index: 2, kind: input, shape index: {}]   ;;  %s1115_s3 = inlined_call_operand.vmem [shape: f32[64,128], index: 3, kind: input, shape index: {}]   ;;  %s1116_s4 = inlined_call_operand.vmem [shape: f32[64,128], index: 4, kind: input, shape index: {}]   ;;  %s1117_s5 = inlined_call_operand.vmem [shape: f32[2,64,128], index: 5, kind: output, shape index: {}]  }
   0x1   :  { %v44_v0 = vld [vmem:[%s1112_s0] sm:$0xff]  ;;  %v45_v1 = vld [vmem:[%s1112_s0 + $0x8] sm:$0xff]  ;;  %v46_v2 = vld [vmem:[%s1112_s0 + $0x10] sm:$0xff] }
   0x2   :  { %v776_v3 = vpack.c.bf16 %v45_v1, %v44_v0  ;;  %v47_v4 = vld [vmem:[%s1112_s0 + $0x18] sm:$0xff]  ;;  %v48_v6 = vld [vmem:[%s1112_s0 + $0x20] sm:$0xff]  ;;  %v49_v7 = vld [vmem:[%s1112_s0 + $0x28] sm:$0xff] }
   0x3   :  { %v780_v5 = vpack.c.bf16 %v47_v4, %v46_v2  ;;  %v891_v8 = vld [vmem:[%s1113_s1] sm:$0xff]  ;;  %v784_v9 = vpack.c.bf16 %v49_v7, %v48_v6  ;;  %v50_v10 = vld [vmem:[%s1112_s0 + $0x30] sm:$0xff]  ;;  %v51_v11 = vld [vmem:[%s1112_s0 + $0x38] sm:$0xff] }
   0x4   :  { %777 = vmatprep.subr.bf16.mxu1 %v776_v3  ;;  %680 = vmatprep.mubr.msk.f32.mxu1 %vm60_vm0, %v891_v8  ;;  %v28_v12 = vld [vmem:[%s1114_s2] sm:$0xff]  ;;  %v29_v13 = vld [vmem:[%s1114_s2 + $0x8] sm:$0xff]  ;;  %v30_v14 = vld [vmem:[%s1114_s2 + $0x10] sm:$0xff]  ;;  %v788_v15 = vpack.c.bf16 %v51_v11, %v50_v10 }
   0x5   :  { %779 = vmatpush3.bf16.msra.mxu1 %v776_v3  ;;  %v52_v16 = vld [vmem:[%s1112_s0 + $0x40] sm:$0xff]  ;;  %v808_v17 = vpack.c.bf16 %v29_v13, %v28_v12  ;;  %v31_v18 = vld [vmem:[%s1114_s2 + $0x18] sm:$0xff]  ;;  %v53_v19 = vld [vmem:[%s1112_s0 + $0x48] sm:$0xff] }
   0x6   :  { %781 = vmatprep.subr.bf16.mxu1 %v780_v5  ;;  %v812_v20 = vpack.c.bf16 %v31_v18, %v30_v14  ;;  %v32_v21 = vld [vmem:[%s1114_s2 + $0x20] sm:$0xff]  ;;  %v33_v22 = vld [vmem:[%s1114_s2 + $0x28] sm:$0xff]  ;;  %v792_v23 = vpack.c.bf16 %v53_v19, %v52_v16  ;;  %v54_v25 = vld [vmem:[%s1112_s0 + $0x50] sm:$0xff] }
   0x7   :  { %809 = vmatprep.subr.bf16.mxu0 %v808_v17  ;;  %v816_v24 = vpack.c.bf16 %v33_v22, %v32_v21  ;;  %v55_v26 = vld [vmem:[%s1112_s0 + $0x58] sm:$0xff]  ;;  %v34_v27 = vld [vmem:[%s1114_s2 + $0x30] sm:$0xff]  ;;  %v21_v29 = vld [vmem:[%s1113_s1 + $0x8] sm:$0xff]  ;;  %v504_v22 = vlaneseq }
   0x8   :  { %811 = vmatpush3.bf16.msra.mxu0 %v808_v17  ;;  %v35_v28 = vld [vmem:[%s1114_s2 + $0x38] sm:$0xff]  ;;  %v22_v30 = vld [vmem:[%s1113_s1 + $0x10] sm:$0xff]  ;;  %v796_v31 = vpack.c.bf16 %v55_v26, %v54_v25  ;;  %v56_v32 = vld [vmem:[%s1112_s0 + $0x60] sm:$0xff] }
   0x9   :  { %783 = vmatpush3.bf16.msra.mxu1 %v780_v5  ;;  %813 = vmatprep.subr.bf16.mxu0 %v812_v20  ;;  %v57_v33 = vld [vmem:[%s1112_s0 + $0x68] sm:$0xff]  ;;  %v820_v34 = vpack.c.bf16 %v35_v28, %v34_v27  ;;  %v36_v35 = vld [vmem:[%s1114_s2 + $0x40] sm:$0xff]  ;;  %v23_v37 = vld [vmem:[%s1113_s1 + $0x18] sm:$0xff] }
   0xa   :  { %785 = vmatprep.subr.bf16.mxu1 %v784_v9  ;;  %v37_v36 = vld [vmem:[%s1114_s2 + $0x48] sm:$0xff]  ;;  %v24_v38 = vld [vmem:[%s1113_s1 + $0x20] sm:$0xff]  ;;  %v800_v39 = vpack.c.bf16 %v57_v33, %v56_v32  ;;  %v58_v40 = vld [vmem:[%s1112_s0 + $0x70] sm:$0xff] }
   0xb   :  { %v59_v41 = vld [vmem:[%s1112_s0 + $0x78] sm:$0xff]  ;;  %v824_v42 = vpack.c.bf16 %v37_v36, %v36_v35  ;;  %v38_v43 = vld [vmem:[%s1114_s2 + $0x50] sm:$0xff]  ;;  %v25_v45 = vld [vmem:[%s1113_s1 + $0x28] sm:$0xff]  ;;  %v505_v35 = vshrl.u32 %v504_v22, 7 }
   0xc   :  { %815 = vmatpush3.bf16.msra.mxu0 %v812_v20  ;;  %v39_v44 = vld [vmem:[%s1114_s2 + $0x58] sm:$0xff]  ;;  %v26_v46 = vld [vmem:[%s1113_s1 + $0x30] sm:$0xff]  ;;  %v804_v47 = vpack.c.bf16 %v59_v41, %v58_v40  ;;  %v40_v49 = vld [vmem:[%s1114_s2 + $0x60] sm:$0xff] }
   0xd   :  { %787 = vmatpush3.bf16.msra.mxu1 %v784_v9  ;;  %817 = vmatprep.subr.bf16.mxu0 %v816_v24  ;;  %v828_v48 = vpack.c.bf16 %v39_v44, %v38_v43  ;;  %v41_v50 = vld [vmem:[%s1114_s2 + $0x68] sm:$0xff]  ;;  %v27_v51 = vld [vmem:[%s1113_s1 + $0x38] sm:$0xff]  ;;  %v42_v53 = vld [vmem:[%s1114_s2 + $0x70] sm:$0xff] }
   0xe   :  { %789 = vmatprep.subr.bf16.mxu1 %v788_v15  ;;  %v832_v52 = vpack.c.bf16 %v41_v50, %v40_v49  ;;  %v43_v54 = vld [vmem:[%s1114_s2 + $0x78] sm:$0xff]  ;;  %v440_v9 = vld [vmem:[%s1115_s3] sm:$0xff]  ;;  %v465_v11 = vld [vmem:[%s1116_s4 + $0x8] sm:$0xff] }
   0xf   :  { %v836_v55 = vpack.c.bf16 %v43_v54, %v42_v53  ;;  %v464_v14 = vld [vmem:[%s1116_s4] sm:$0xff]  ;;  %v443_v16 = vld [vmem:[%s1115_s3 + $0x18] sm:$0xff]  ;;  %v1028_v18 = vld [vmem:[%s1115_s3 + $0x10] sm:$0xff] }
  0x10   :  { %819 = vmatpush3.bf16.msra.mxu0 %v816_v24  ;;  %v467_v21 = vld [vmem:[%s1116_s4 + $0x18] sm:$0xff]  ;;  %v466_v26 = vld [vmem:[%s1116_s4 + $0x10] sm:$0xff] }
  0x11   :  { %791 = vmatpush3.bf16.msra.mxu1 %v788_v15  ;;  %821 = vmatprep.subr.bf16.mxu0 %v820_v34  ;;  %v446_v44 = vld [vmem:[%s1115_s3 + $0x30] sm:$0xff] }
  0x12   :  { %793 = vmatprep.subr.bf16.mxu1 %v792_v23 }
  0x14   :  { %681 = vmatmul.mubr.msk.f32.vlgmr.msra.gmra.mrb[0].mxu1 %vm60_vm0, %v21_v29  ;;  %823 = vmatpush3.bf16.msra.mxu0 %v820_v34  ;;  %v469_v34 = vld [vmem:[%s1116_s4 + $0x28] sm:$0xff] }
  0x15   :  { %795 = vmatpush3.bf16.msra.mxu1 %v792_v23  ;;  %683 = vmatprep.mubr.msk.f32.mxu1 %vm60_vm0, %v22_v30 }
  0x16   :  { %797 = vmatprep.subr.bf16.mxu1 %v796_v31  ;;  %825 = vmatprep.subr.bf16.mxu0 %v824_v42 }
  0x18   :  { %684 = vmatmul.mubr.msk.f32.gmra.mrb[2].mxu1 %vm60_vm0, %v23_v37  ;;  %827 = vmatpush3.bf16.msra.mxu0 %v824_v42  ;;  %v447_v42 = vld [vmem:[%s1115_s3 + $0x38] sm:$0xff] }
  0x19   :  { %799 = vmatpush3.bf16.msra.mxu1 %v796_v31  ;;  %686 = vmatprep.mubr.msk.f32.mxu1 %vm60_vm0, %v24_v38  ;;  %v444_v31 = vld [vmem:[%s1115_s3 + $0x20] sm:$0xff] }
  0x1a   :  { %801 = vmatprep.subr.bf16.mxu1 %v800_v39  ;;  %829 = vmatprep.subr.bf16.mxu0 %v828_v48 }
  0x1c   :  { %687 = vmatmul.mubr.msk.f32.gmra.mrb[4].mxu1 %vm60_vm0, %v25_v45  ;;  %831 = vmatpush3.bf16.msra.mxu0 %v828_v48  ;;  %v512_v48 = vadd.s32 56, %v505_v35 }
  0x1d   :  { %803 = vmatpush3.bf16.msra.mxu1 %v800_v39  ;;  %689 = vmatprep.mubr.msk.f32.mxu1 %vm60_vm0, %v26_v46  ;;  %v468_v39 = vld [vmem:[%s1116_s4 + $0x20] sm:$0xff] }
  0x1e   :  { %805 = vmatprep.subr.bf16.mxu1 %v804_v47  ;;  %833 = vmatprep.subr.bf16.mxu0 %v832_v52  ;;  %vm522_vm1 = vcmp.lt.s32.totalorder %v512_v48, 57 }
  0x20   :  { %690 = vmatmul.mubr.msk.f32.gmra.mrb[6].mxu1 %vm60_vm0, %v27_v51  ;;  %835 = vmatpush3.bf16.msra.mxu0 %v832_v52  ;;  %v470_v52 = vld [vmem:[%s1116_s4 + $0x30] sm:$0xff] }
  0x21   :  { %807 = vmatpush3.bf16.msra.mxu1 %v804_v47  ;;  %708 = vmatprep.mubr.msk.f32.mxu1 %vm60_vm0, %v891_v8  ;;  %v441_v8 = vld [vmem:[%s1115_s3 + $0x8] sm:$0xff]  ;;  %v471_v47 = vld [vmem:[%s1116_s4 + $0x38] sm:$0xff] }
  0x22   :  { %837 = vmatprep.subr.bf16.mxu0 %v836_v55 }
  0x24   :  { %709 = vmatmul.mubr.msk.f32.vlgmr.msra.gmra.mrb[8].mxu1 %vm60_vm0, %v21_v29  ;;  %839 = vmatpush3.bf16.msra.mxu0 %v836_v55  ;;  %v445_v29 = vld [vmem:[%s1115_s3 + $0x28] sm:$0xff] }
  0x25   :  { %711 = vmatprep.mubr.msk.f32.mxu1 %vm60_vm0, %v22_v30 }
  0x28   :  { %712 = vmatmul.mubr.msk.f32.gmra.mrb[10].mxu1 %vm60_vm0, %v23_v37 }
  0x29   :  { %714 = vmatprep.mubr.msk.f32.mxu1 %vm60_vm0, %v24_v38 }
  0x2c   :  { %715 = vmatmul.mubr.msk.f32.gmra.mrb[12].mxu1 %vm60_vm0, %v25_v45 }
  0x2d   :  { %717 = vmatprep.mubr.msk.f32.mxu1 %vm60_vm0, %v26_v46 }
  0x30   :  { %718 = vmatmul.mubr.msk.f32.gmra.mrb[14].mxu1 %vm60_vm0, %v27_v51 }
  0xe7   :  { %v682_v56 = vpop.f32.mrb[0].mxu1 }
  0xe8   :  { %v151_v57 = vpop.f32.mrb[1].mxu1 }
  0xe9   :  { %752 = vmatprep.mubr.f32.mxu0 %v151_v57 }
  0xea   :  { %753 = vmatmul.mubr.f32.vlgmr.msra.gmra.mrb[0].mxu0 %v682_v56 }
  0xeb   :  { %v685_v58 = vpop.f32.mrb[2].mxu1 }
  0xec   :  { %v161_v59 = vpop.f32.mrb[3].mxu1 }
  0xed   :  { %755 = vmatprep.mubr.f32.mxu0 %v161_v59 }
  0xee   :  { %756 = vmatmul.mubr.f32.gmra.mrb[2].mxu0 %v685_v58 }
  0xef   :  { %v688_v60 = vpop.f32.mrb[4].mxu1 }
  0xf0   :  { %v171_v61 = vpop.f32.mrb[5].mxu1 }
  0xf1   :  { %758 = vmatprep.mubr.f32.mxu0 %v171_v61 }
  0xf2   :  { %759 = vmatmul.mubr.f32.gmra.mrb[4].mxu0 %v688_v60 }
  0xf3   :  { %v691_v62 = vpop.f32.mrb[6].mxu1 }
  0xf4   :  { %v181_v63 = vpop.f32.mrb[7].mxu1 }
  0xf5   :  { %761 = vmatprep.mubr.f32.mxu0 %v181_v63 }
  0xf6   :  { %762 = vmatmul.mubr.f32.gmra.mrb[6].mxu0 %v691_v62 }
  0xf7   :  { %v710_v0 = vpop.f32.mrb[8].mxu1 }
  0xf8   :  { %v256_v1 = vpop.f32.mrb[9].mxu1 }
  0xf9   :  { %764 = vmatprep.mubr.f32.mxu0 %v256_v1 }
  0xfa   :  { %765 = vmatmul.mubr.f32.gmra.mrb[8].mxu0 %v710_v0 }
  0xfb   :  { %v713_v2 = vpop.f32.mrb[10].mxu1 }
  0xfc   :  { %v266_v3 = vpop.f32.mrb[11].mxu1 }
  0xfd   :  { %767 = vmatprep.mubr.f32.mxu0 %v266_v3 }
  0xfe   :  { %768 = vmatmul.mubr.f32.gmra.mrb[10].mxu0 %v713_v2 }
  0xff   :  { %v716_v4 = vpop.f32.mrb[12].mxu1 }
 0x100   :  { %v276_v5 = vpop.f32.mrb[13].mxu1 }
 0x101   :  { %770 = vmatprep.mubr.f32.mxu0 %v276_v5 }
 0x102   :  { %771 = vmatmul.mubr.f32.gmra.mrb[12].mxu0 %v716_v4 }
 0x103   :  { %v719_v6 = vpop.f32.mrb[14].mxu1 }
 0x104   :  { %v286_v7 = vpop.f32.mrb[15].mxu1 }
 0x105   :  { %773 = vmatprep.mubr.f32.mxu0 %v286_v7 }
 0x106   :  { %774 = vmatmul.mubr.f32.gmra.mrb[14].mxu0 %v719_v6 }
 0x1bd   :  { %v754_v10 = vpop.f32.mrb[0].mxu0 }
 0x1be   :  { %v449_v12 = vmul.f32 %v754_v10, %v441_v8  ;;  %v361_v13 = vpop.f32.mrb[1].mxu0 }
 0x1bf   :  { %v448_v15 = vmul.f32 %v440_v9, %v361_v13 }
 0x1c0   :  { %v473_v17 = vadd.f32 %v465_v11, %v449_v12 }
 0x1c1   :  { %v472_v19 = vadd.f32 %v464_v14, %v448_v15  ;;  %v757_v20 = vpop.f32.mrb[2].mxu0 }
 0x1c2   :  { %v489_v23 = vmax.f32 %v473_v17, 0.0  ;;  %v451_v24 = vmul.f32 %v757_v20, %v443_v16  ;;  %v371_v25 = vpop.f32.mrb[3].mxu0 }
 0x1c3   :  { %v488_v27 = vmax.f32 %v472_v19, 0.0  ;;  %v450_v28 = vmul.f32 %v1028_v18, %v371_v25 }
 0x1c4   :  { %565 = vst [vmem:[%s1117_s5 + $0x8] sm:$0xff] %v489_v23  ;;  %v475_v30 = vadd.f32 %v467_v21, %v451_v24 }
 0x1c5   :  { %564 = vst [vmem:[%s1117_s5] sm:$0xff] %v488_v27  ;;  %v474_v32 = vadd.f32 %v466_v26, %v450_v28  ;;  %v760_v33 = vpop.f32.mrb[4].mxu0 }
 0x1c6   :  { %v491_v36 = vmax.f32 %v475_v30, 0.0  ;;  %v453_v37 = vmul.f32 %v760_v33, %v445_v29  ;;  %v381_v38 = vpop.f32.mrb[5].mxu0 }
 0x1c7   :  { %v490_v40 = vmax.f32 %v474_v32, 0.0  ;;  %v452_v41 = vmul.f32 %v444_v31, %v381_v38 }
 0x1c8   :  { %567 = vst [vmem:[%s1117_s5 + $0x18] sm:$0xff] %v491_v36  ;;  %v477_v43 = vadd.f32 %v469_v34, %v453_v37 }
 0x1c9   :  { %566 = vst [vmem:[%s1117_s5 + $0x10] sm:$0xff] %v490_v40  ;;  %v476_v45 = vadd.f32 %v468_v39, %v452_v41  ;;  %v763_v46 = vpop.f32.mrb[6].mxu0 }
 0x1ca   :  { %v493_v49 = vmax.f32 %v477_v43, 0.0  ;;  %v455_v50 = vmul.f32 %v763_v46, %v447_v42  ;;  %v391_v51 = vpop.f32.mrb[7].mxu0 }
 0x1cb   :  { %v492_v53 = vmax.f32 %v476_v45, 0.0  ;;  %v454_v54 = vmul.f32 %v446_v44, %v391_v51 }
 0x1cc   :  { %569 = vst [vmem:[%s1117_s5 + $0x28] sm:$0xff] %v493_v49  ;;  %v479_v55 = vadd.f32 %v471_v47, %v455_v50 }
 0x1cd   :  { %568 = vst [vmem:[%s1117_s5 + $0x20] sm:$0xff] %v492_v53  ;;  %v478_v56 = vadd.f32 %v470_v52, %v454_v54  ;;  %v766_v57 = vpop.f32.mrb[8].mxu0 }
 0x1ce   :  { %v495_v58 = vmax.f32 %v479_v55, 0.0  ;;  %v457_v59 = vmul.f32 %v766_v57, %v441_v8  ;;  %v401_v60 = vpop.f32.mrb[9].mxu0 }
 0x1cf   :  { %v494_v61 = vmax.f32 %v478_v56, 0.0  ;;  %v456_v62 = vmul.f32 %v440_v9, %v401_v60 }
 0x1d0   :  { %v555_v63 = vsel %vm522_vm1, %v495_v58, 0.0  ;;  %v481_v0 = vadd.f32 %v465_v11, %v457_v59 }
 0x1d1   :  { %571 = vst [vmem:[%s1117_s5 + $0x38] sm:$0xff] %v555_v63  ;;  %570 = vst [vmem:[%s1117_s5 + $0x30] sm:$0xff] %v494_v61  ;;  %v480_v1 = vadd.f32 %v464_v14, %v456_v62  ;;  %v769_v2 = vpop.f32.mrb[10].mxu0 }
 0x1d2   :  { %v497_v3 = vmax.f32 %v481_v0, 0.0  ;;  %v459_v4 = vmul.f32 %v769_v2, %v443_v16  ;;  %v411_v5 = vpop.f32.mrb[11].mxu0 }
 0x1d3   :  { %v496_v6 = vmax.f32 %v480_v1, 0.0  ;;  %v458_v7 = vmul.f32 %v1028_v18, %v411_v5 }
 0x1d4   :  { %573 = vst [vmem:[%s1117_s5 + $0x48] sm:$0xff] %v497_v3  ;;  %v483_v8 = vadd.f32 %v467_v21, %v459_v4 }
 0x1d5   :  { %572 = vst [vmem:[%s1117_s5 + $0x40] sm:$0xff] %v496_v6  ;;  %v482_v9 = vadd.f32 %v466_v26, %v458_v7  ;;  %v772_v10 = vpop.f32.mrb[12].mxu0 }
 0x1d6   :  { %v499_v11 = vmax.f32 %v483_v8, 0.0  ;;  %v461_v12 = vmul.f32 %v772_v10, %v445_v29  ;;  %v421_v13 = vpop.f32.mrb[13].mxu0 }
 0x1d7   :  { %v498_v14 = vmax.f32 %v482_v9, 0.0  ;;  %v460_v15 = vmul.f32 %v444_v31, %v421_v13 }
 0x1d8   :  { %575 = vst [vmem:[%s1117_s5 + $0x58] sm:$0xff] %v499_v11  ;;  %v485_v16 = vadd.f32 %v469_v34, %v461_v12 }
 0x1d9   :  { %574 = vst [vmem:[%s1117_s5 + $0x50] sm:$0xff] %v498_v14  ;;  %v484_v17 = vadd.f32 %v468_v39, %v460_v15  ;;  %v775_v18 = vpop.f32.mrb[14].mxu0 }
 0x1da   :  { %v501_v19 = vmax.f32 %v485_v16, 0.0  ;;  %v463_v20 = vmul.f32 %v775_v18, %v447_v42  ;;  %v431_v21 = vpop.f32.mrb[15].mxu0 }
 0x1db   :  { %v500_v22 = vmax.f32 %v484_v17, 0.0  ;;  %v462_v23 = vmul.f32 %v446_v44, %v431_v21 }
 0x1dc   :  { %577 = vst [vmem:[%s1117_s5 + $0x68] sm:$0xff] %v501_v19  ;;  %v487_v24 = vadd.f32 %v471_v47, %v463_v20 }
 0x1dd   :  { %576 = vst [vmem:[%s1117_s5 + $0x60] sm:$0xff] %v500_v22  ;;  %v486_v25 = vadd.f32 %v470_v52, %v462_v23 }
 0x1de   :  { %v503_v26 = vmax.f32 %v487_v24, 0.0 }
 0x1df   :  { %v502_v27 = vmax.f32 %v486_v25, 0.0 }
 0x1e0   :  { %v563_v28 = vsel %vm522_vm1, %v503_v26, 0.0 }
 0x1e1   :  { %579 = vst [vmem:[%s1117_s5 + $0x78] sm:$0xff] %v563_v28  ;;  %578 = vst [vmem:[%s1117_s5 + $0x70] sm:$0xff] %v502_v27 }

// kernel: fwd.5
= control target key start
LH: loop header
LB: loop body
LE: loop exit
PB: predicated region body
PF: predicated region fallthrough
CT: control target
= control target key end

     0   :  { %vm72_vm0 = vcmask 523264   ;;  %s2144_s0 = inlined_call_operand.vmem [shape: f32[2,64,128], index: 0, kind: input, shape index: {}]   ;;  %s2145_s1 = inlined_call_operand.vmem [shape: f32[64,64], index: 1, kind: input, shape index: {}]   ;;  %s2146_s2 = inlined_call_operand.vmem [shape: f32[128,128], index: 2, kind: input, shape index: {}]   ;;  %s2147_s5 = inlined_call_operand.vmem [shape: f32[64,64], index: 5, kind: input, shape index: {}]   ;;  %s2148_s6 = inlined_call_operand.vmem [shape: f32[128,128], index: 6, kind: input, shape index: {}]   ;;  %s2149_s3 = inlined_call_operand.vmem [shape: f32[64,128], index: 3, kind: input, shape index: {}]   ;;  %s2150_s4 = inlined_call_operand.vmem [shape: f32[64,128], index: 4, kind: input, shape index: {}]   ;;  %s2151_s7 = inlined_call_operand.vmem [shape: f32[64,128], index: 7, kind: input, shape index: {}]   ;;  %s2152_s8 = inlined_call_operand.vmem [shape: f32[64,128], index: 8, kind: input, shape index: {}]   ;;  %s2153_s9 = inlined_call_operand.vmem [shape: f32[2,64,128], index: 9, kind: output, shape index: {}]  }
   0x1   :  { %v1644_v0 = vld [vmem:[%s2144_s0] sm:$0xff]  ;;  %v1649_v1 = vld [vmem:[%s2144_s0 + $0x8] sm:$0xff]  ;;  %v1654_v2 = vld [vmem:[%s2144_s0 + $0x10] sm:$0xff] }
   0x2   :  { %v1463_v3 = vpack.c.bf16 %v1649_v1, %v1644_v0  ;;  %v1661_v4 = vld [vmem:[%s2144_s0 + $0x18] sm:$0xff]  ;;  %v1668_v6 = vld [vmem:[%s2144_s0 + $0x20] sm:$0xff]  ;;  %v1673_v7 = vld [vmem:[%s2144_s0 + $0x28] sm:$0xff] }
   0x3   :  { %v1467_v5 = vpack.c.bf16 %v1661_v4, %v1654_v2  ;;  %v1678_v8 = vld [vmem:[%s2145_s1] sm:$0xff]  ;;  %v1471_v9 = vpack.c.bf16 %v1673_v7, %v1668_v6  ;;  %v1687_v10 = vld [vmem:[%s2144_s0 + $0x30] sm:$0xff]  ;;  %v1692_v11 = vld [vmem:[%s2144_s0 + $0x38] sm:$0xff] }
   0x4   :  { %1464 = vmatprep.subr.bf16.mxu1 %v1463_v3  ;;  %1255 = vmatprep.mubr.msk.f32.mxu1 %vm72_vm0, %v1678_v8  ;;  %v56_v12 = vld [vmem:[%s2146_s2] sm:$0xff]  ;;  %v57_v13 = vld [vmem:[%s2146_s2 + $0x8] sm:$0xff]  ;;  %v58_v14 = vld [vmem:[%s2146_s2 + $0x10] sm:$0xff]  ;;  %v1475_v15 = vpack.c.bf16 %v1692_v11, %v1687_v10 }
   0x5   :  { %1466 = vmatpush3.bf16.msra.mxu1 %v1463_v3  ;;  %v1708_v16 = vld [vmem:[%s2144_s0 + $0x40] sm:$0xff]  ;;  %v1495_v17 = vpack.c.bf16 %v57_v13, %v56_v12  ;;  %v59_v18 = vld [vmem:[%s2146_s2 + $0x18] sm:$0xff]  ;;  %v1716_v19 = vld [vmem:[%s2144_s0 + $0x48] sm:$0xff] }
   0x6   :  { %1468 = vmatprep.subr.bf16.mxu1 %v1467_v5  ;;  %v1499_v20 = vpack.c.bf16 %v59_v18, %v58_v14  ;;  %v60_v21 = vld [vmem:[%s2146_s2 + $0x20] sm:$0xff]  ;;  %v61_v22 = vld [vmem:[%s2146_s2 + $0x28] sm:$0xff]  ;;  %v1479_v23 = vpack.c.bf16 %v1716_v19, %v1708_v16  ;;  %v1729_v25 = vld [vmem:[%s2144_s0 + $0x50] sm:$0xff] }
   0x7   :  { %1496 = vmatprep.subr.bf16.mxu0 %v1495_v17  ;;  %v1503_v24 = vpack.c.bf16 %v61_v22, %v60_v21  ;;  %v1734_v26 = vld [vmem:[%s2144_s0 + $0x58] sm:$0xff]  ;;  %v62_v27 = vld [vmem:[%s2146_s2 + $0x30] sm:$0xff]  ;;  %v49_v29 = vld [vmem:[%s2145_s1 + $0x8] sm:$0xff] }
   0x8   :  { %1498 = vmatpush3.bf16.msra.mxu0 %v1495_v17  ;;  %v63_v28 = vld [vmem:[%s2146_s2 + $0x38] sm:$0xff]  ;;  %v50_v30 = vld [vmem:[%s2145_s1 + $0x10] sm:$0xff]  ;;  %v1483_v31 = vpack.c.bf16 %v1734_v26, %v1729_v25  ;;  %v1753_v32 = vld [vmem:[%s2144_s0 + $0x60] sm:$0xff] }
   0x9   :  { %1470 = vmatpush3.bf16.msra.mxu1 %v1467_v5  ;;  %1500 = vmatprep.subr.bf16.mxu0 %v1499_v20  ;;  %v1758_v33 = vld [vmem:[%s2144_s0 + $0x68] sm:$0xff]  ;;  %v1507_v34 = vpack.c.bf16 %v63_v28, %v62_v27  ;;  %v64_v35 = vld [vmem:[%s2146_s2 + $0x40] sm:$0xff]  ;;  %v51_v37 = vld [vmem:[%s2145_s1 + $0x18] sm:$0xff] }
   0xa   :  { %1472 = vmatprep.subr.bf16.mxu1 %v1471_v9  ;;  %v65_v36 = vld [vmem:[%s2146_s2 + $0x48] sm:$0xff]  ;;  %v52_v38 = vld [vmem:[%s2145_s1 + $0x20] sm:$0xff]  ;;  %v1487_v39 = vpack.c.bf16 %v1758_v33, %v1753_v32  ;;  %v1779_v40 = vld [vmem:[%s2144_s0 + $0x70] sm:$0xff] }
   0xb   :  { %v1784_v41 = vld [vmem:[%s2144_s0 + $0x78] sm:$0xff]  ;;  %v1511_v42 = vpack.c.bf16 %v65_v36, %v64_v35  ;;  %v66_v43 = vld [vmem:[%s2146_s2 + $0x50] sm:$0xff]  ;;  %v53_v45 = vld [vmem:[%s2145_s1 + $0x28] sm:$0xff] }
   0xc   :  { %1502 = vmatpush3.bf16.msra.mxu0 %v1499_v20  ;;  %v67_v44 = vld [vmem:[%s2146_s2 + $0x58] sm:$0xff]  ;;  %v54_v46 = vld [vmem:[%s2145_s1 + $0x30] sm:$0xff]  ;;  %v1491_v47 = vpack.c.bf16 %v1784_v41, %v1779_v40  ;;  %v68_v49 = vld [vmem:[%s2146_s2 + $0x60] sm:$0xff] }
   0xd   :  { %1474 = vmatpush3.bf16.msra.mxu1 %v1471_v9  ;;  %1504 = vmatprep.subr.bf16.mxu0 %v1503_v24  ;;  %v1515_v48 = vpack.c.bf16 %v67_v44, %v66_v43  ;;  %v69_v50 = vld [vmem:[%s2146_s2 + $0x68] sm:$0xff]  ;;  %v55_v51 = vld [vmem:[%s2145_s1 + $0x38] sm:$0xff]  ;;  %v70_v53 = vld [vmem:[%s2146_s2 + $0x70] sm:$0xff] }
   0xe   :  { %1476 = vmatprep.subr.bf16.mxu1 %v1475_v15  ;;  %v1519_v52 = vpack.c.bf16 %v69_v50, %v68_v49  ;;  %v71_v54 = vld [vmem:[%s2146_s2 + $0x78] sm:$0xff]  ;;  %v1832_v17 = vld [vmem:[%s2147_s5] sm:$0xff]  ;;  %v525_v20 = vld [vmem:[%s2148_s6 + $0x8] sm:$0xff] }
   0xf   :  { %v1523_v55 = vpack.c.bf16 %v71_v54, %v70_v53  ;;  %v524_v18 = vld [vmem:[%s2148_s6] sm:$0xff]  ;;  %v526_v21 = vld [vmem:[%s2148_s6 + $0x10] sm:$0xff]  ;;  %v529_v28 = vld [vmem:[%s2148_s6 + $0x28] sm:$0xff] }
  0x10   :  { %1506 = vmatpush3.bf16.msra.mxu0 %v1503_v24  ;;  %v1559_v22 = vpack.c.bf16 %v525_v20, %v524_v18  ;;  %v528_v27 = vld [vmem:[%s2148_s6 + $0x20] sm:$0xff]  ;;  %v533_v36 = vld [vmem:[%s2148_s6 + $0x48] sm:$0xff] }
  0x11   :  { %1478 = vmatpush3.bf16.msra.mxu1 %v1475_v15  ;;  %1508 = vmatprep.subr.bf16.mxu0 %v1507_v34  ;;  %v532_v35 = vld [vmem:[%s2148_s6 + $0x40] sm:$0xff]  ;;  %v537_v44 = vld [vmem:[%s2148_s6 + $0x68] sm:$0xff] }
  0x12   :  { %1480 = vmatprep.subr.bf16.mxu1 %v1479_v23  ;;  %v536_v43 = vld [vmem:[%s2148_s6 + $0x60] sm:$0xff]  ;;  %v453_v49 = vld [vmem:[%s2149_s3 + $0x8] sm:$0xff] }
  0x13   :  { %v452_v50 = vld [vmem:[%s2149_s3] sm:$0xff] }
  0x14   :  { %1256 = vmatmul.mubr.msk.f32.vlgmr.msra.gmra.mrb[0].mxu1 %vm72_vm0, %v49_v29  ;;  %1510 = vmatpush3.bf16.msra.mxu0 %v1507_v34 }
  0x15   :  { %1482 = vmatpush3.bf16.msra.mxu1 %v1479_v23  ;;  %1258 = vmatprep.mubr.msk.f32.mxu1 %vm72_vm0, %v50_v30  ;;  %v527_v23 = vld [vmem:[%s2148_s6 + $0x18] sm:$0xff] }
  0x16   :  { %1484 = vmatprep.subr.bf16.mxu1 %v1483_v31  ;;  %1512 = vmatprep.subr.bf16.mxu0 %v1511_v42  ;;  %v1563_v24 = vpack.c.bf16 %v527_v23, %v526_v21  ;;  %v481_v21 = vld [vmem:[%s2150_s4 + $0x28] sm:$0xff] }
  0x18   :  { %1259 = vmatmul.mubr.msk.f32.gmra.mrb[2].mxu1 %vm72_vm0, %v51_v37  ;;  %1514 = vmatpush3.bf16.msra.mxu0 %v1511_v42 }
  0x19   :  { %1486 = vmatpush3.bf16.msra.mxu1 %v1483_v31  ;;  %1261 = vmatprep.mubr.msk.f32.mxu1 %vm72_vm0, %v52_v38  ;;  %v531_v31 = vld [vmem:[%s2148_s6 + $0x38] sm:$0xff] }
  0x1a   :  { %1488 = vmatprep.subr.bf16.mxu1 %v1487_v39  ;;  %1516 = vmatprep.subr.bf16.mxu0 %v1515_v48 }
  0x1c   :  { %1262 = vmatmul.mubr.msk.f32.gmra.mrb[4].mxu1 %vm72_vm0, %v53_v45  ;;  %1518 = vmatpush3.bf16.msra.mxu0 %v1515_v48 }
  0x1d   :  { %1490 = vmatpush3.bf16.msra.mxu1 %v1487_v39  ;;  %1264 = vmatprep.mubr.msk.f32.mxu1 %vm72_vm0, %v54_v46  ;;  %v535_v39 = vld [vmem:[%s2148_s6 + $0x58] sm:$0xff] }
  0x1e   :  { %1492 = vmatprep.subr.bf16.mxu1 %v1491_v47  ;;  %1520 = vmatprep.subr.bf16.mxu0 %v1519_v52 }
  0x20   :  { %1265 = vmatmul.mubr.msk.f32.gmra.mrb[6].mxu1 %vm72_vm0, %v55_v51  ;;  %1522 = vmatpush3.bf16.msra.mxu0 %v1519_v52  ;;  %v477_v52 = vld [vmem:[%s2150_s4 + $0x8] sm:$0xff] }
  0x21   :  { %1494 = vmatpush3.bf16.msra.mxu1 %v1491_v47  ;;  %1283 = vmatprep.mubr.msk.f32.mxu1 %vm72_vm0, %v1678_v8  ;;  %v539_v47 = vld [vmem:[%s2148_s6 + $0x78] sm:$0xff] }
  0x22   :  { %1524 = vmatprep.subr.bf16.mxu0 %v1523_v55 }
  0x24   :  { %1284 = vmatmul.mubr.msk.f32.vlgmr.msra.gmra.mrb[8].mxu1 %vm72_vm0, %v49_v29  ;;  %1526 = vmatpush3.bf16.msra.mxu0 %v1523_v55  ;;  %v1567_v29 = vpack.c.bf16 %v529_v28, %v528_v27  ;;  %v476_v55 = vld [vmem:[%s2150_s4] sm:$0xff] }
  0x25   :  { %1286 = vmatprep.mubr.msk.f32.mxu1 %vm72_vm0, %v50_v30  ;;  %1560 = vmatprep.subr.bf16.mxu0 %v1559_v22  ;;  %v530_v30 = vld [vmem:[%s2148_s6 + $0x30] sm:$0xff]  ;;  %v480_v28 = vld [vmem:[%s2150_s4 + $0x20] sm:$0xff] }
  0x26   :  { %v1571_v34 = vpack.c.bf16 %v531_v31, %v530_v30  ;;  %v459_v31 = vld [vmem:[%s2149_s3 + $0x38] sm:$0xff] }
  0x28   :  { %1287 = vmatmul.mubr.msk.f32.gmra.mrb[10].mxu1 %vm72_vm0, %v51_v37  ;;  %v1575_v37 = vpack.c.bf16 %v533_v36, %v532_v35  ;;  %v458_v35 = vld [vmem:[%s2149_s3 + $0x30] sm:$0xff] }
  0x29   :  { %1289 = vmatprep.mubr.msk.f32.mxu1 %vm72_vm0, %v52_v38  ;;  %v534_v38 = vld [vmem:[%s2148_s6 + $0x50] sm:$0xff] }
  0x2a   :  { %v1579_v42 = vpack.c.bf16 %v535_v39, %v534_v38  ;;  %v483_v38 = vld [vmem:[%s2150_s4 + $0x38] sm:$0xff] }
  0x2c   :  { %1290 = vmatmul.mubr.msk.f32.gmra.mrb[12].mxu1 %vm72_vm0, %v53_v45  ;;  %v1583_v45 = vpack.c.bf16 %v537_v44, %v536_v43 }
  0x2d   :  { %1292 = vmatprep.mubr.msk.f32.mxu1 %vm72_vm0, %v54_v46  ;;  %v538_v46 = vld [vmem:[%s2148_s6 + $0x70] sm:$0xff] }
  0x2e   :  { %v1587_v48 = vpack.c.bf16 %v539_v47, %v538_v46 }
  0x30   :  { %1293 = vmatmul.mubr.msk.f32.gmra.mrb[14].mxu1 %vm72_vm0, %v55_v51 }
  0x31   :  { %1367 = vmatprep.mubr.msk.f32.mxu1 %vm72_vm0, %v1832_v17 }
  0xe7   :  { %v1257_v56 = vpop.f32.mrb[0].mxu1 }
  0xe8   :  { %v163_v57 = vpop.f32.mrb[1].mxu1 }
  0xe9   :  { %1327 = vmatprep.mubr.f32.mxu0 %v163_v57  ;;  %v455_v57 = vld [vmem:[%s2149_s3 + $0x18] sm:$0xff] }
  0xea   :  { %1328 = vmatmul.mubr.f32.vlgmr.msra.gmra.mrb[0].mxu0 %v1257_v56 }
  0xeb   :  { %v1260_v58 = vpop.f32.mrb[2].mxu1  ;;  %1562 = vmatpush3.bf16.msra.mxu0 %v1559_v22 }
  0xec   :  { %v173_v59 = vpop.f32.mrb[3].mxu1  ;;  %1564 = vmatprep.subr.bf16.mxu0 %v1563_v24 }
  0xed   :  { %1330 = vmatprep.mubr.f32.mxu0 %v173_v59  ;;  %v454_v59 = vld [vmem:[%s2149_s3 + $0x10] sm:$0xff] }
  0xee   :  { %1331 = vmatmul.mubr.f32.gmra.mrb[2].mxu0 %v1260_v58 }
  0xef   :  { %v1263_v60 = vpop.f32.mrb[4].mxu1  ;;  %1566 = vmatpush3.bf16.msra.mxu0 %v1563_v24 }
  0xf0   :  { %v183_v61 = vpop.f32.mrb[5].mxu1  ;;  %1568 = vmatprep.subr.bf16.mxu0 %v1567_v29 }
  0xf1   :  { %1333 = vmatprep.mubr.f32.mxu0 %v183_v61 }
  0xf2   :  { %1334 = vmatmul.mubr.f32.gmra.mrb[4].mxu0 %v1263_v60 }
  0xf3   :  { %v1266_v62 = vpop.f32.mrb[6].mxu1  ;;  %1570 = vmatpush3.bf16.msra.mxu0 %v1567_v29 }
  0xf4   :  { %v193_v63 = vpop.f32.mrb[7].mxu1  ;;  %1572 = vmatprep.subr.bf16.mxu0 %v1571_v34 }
  0xf5   :  { %1336 = vmatprep.mubr.f32.mxu0 %v193_v63 }
  0xf6   :  { %1337 = vmatmul.mubr.f32.gmra.mrb[6].mxu0 %v1266_v62  ;;  %v479_v62 = vld [vmem:[%s2150_s4 + $0x18] sm:$0xff] }
  0xf7   :  { %v1285_v3 = vpop.f32.mrb[8].mxu1  ;;  %1574 = vmatpush3.bf16.msra.mxu0 %v1571_v34 }
  0xf8   :  { %v268_v5 = vpop.f32.mrb[9].mxu1  ;;  %1576 = vmatprep.subr.bf16.mxu0 %v1575_v37 }
  0xf9   :  { %1339 = vmatprep.mubr.f32.mxu0 %v268_v5 }
  0xfa   :  { %1340 = vmatmul.mubr.f32.gmra.mrb[8].mxu0 %v1285_v3 }
  0xfb   :  { %v1288_v8 = vpop.f32.mrb[10].mxu1  ;;  %1578 = vmatpush3.bf16.msra.mxu0 %v1575_v37 }
  0xfc   :  { %v278_v9 = vpop.f32.mrb[11].mxu1  ;;  %1580 = vmatprep.subr.bf16.mxu0 %v1579_v42 }
  0xfd   :  { %1342 = vmatprep.mubr.f32.mxu0 %v278_v9 }
  0xfe   :  { %1343 = vmatmul.mubr.f32.gmra.mrb[10].mxu0 %v1288_v8  ;;  %v478_v8 = vld [vmem:[%s2150_s4 + $0x10] sm:$0xff] }
  0xff   :  { %v1291_v12 = vpop.f32.mrb[12].mxu1  ;;  %1582 = vmatpush3.bf16.msra.mxu0 %v1579_v42 }
 0x100   :  { %v288_v13 = vpop.f32.mrb[13].mxu1  ;;  %1584 = vmatprep.subr.bf16.mxu0 %v1583_v45 }
 0x101   :  { %1345 = vmatprep.mubr.f32.mxu0 %v288_v13  ;;  %v457_v13 = vld [vmem:[%s2149_s3 + $0x28] sm:$0xff] }
 0x102   :  { %1346 = vmatmul.mubr.f32.gmra.mrb[12].mxu0 %v1291_v12 }
 0x103   :  { %v1294_v14 = vpop.f32.mrb[14].mxu1  ;;  %1586 = vmatpush3.bf16.msra.mxu0 %v1583_v45  ;;  %v482_v45 = vld [vmem:[%s2150_s4 + $0x30] sm:$0xff] }
 0x104   :  { %v298_v15 = vpop.f32.mrb[15].mxu1  ;;  %1588 = vmatprep.subr.bf16.mxu0 %v1587_v48 }
 0x105   :  { %1348 = vmatprep.mubr.f32.mxu0 %v298_v15  ;;  %v456_v15 = vld [vmem:[%s2149_s3 + $0x20] sm:$0xff] }
 0x106   :  { %1349 = vmatmul.mubr.f32.gmra.mrb[14].mxu0 %v1294_v14 }
 0x107   :  { %1590 = vmatpush3.bf16.msra.mxu0 %v1587_v48 }
 0x1bd   :  { %v1329_v51 = vpop.f32.mrb[0].mxu0 }
 0x1be   :  { %v461_v53 = vmul.f32 %v1329_v51, %v453_v49  ;;  %v373_v54 = vpop.f32.mrb[1].mxu0 }
 0x1bf   :  { %v460_v56 = vmul.f32 %v452_v50, %v373_v54 }
 0x1c0   :  { %v485_v58 = vadd.f32 %v477_v52, %v461_v53 }
 0x1c1   :  { %v484_v60 = vadd.f32 %v476_v55, %v460_v56  ;;  %v1332_v61 = vpop.f32.mrb[2].mxu0 }
 0x1c2   :  { %v501_v63 = vmax.f32 %v485_v58, 0.0  ;;  %v463_v3 = vmul.f32 %v1332_v61, %v455_v57  ;;  %v383_v5 = vpop.f32.mrb[3].mxu0 }
 0x1c3   :  { %v500_v9 = vmax.f32 %v484_v60, 0.0  ;;  %v462_v12 = vmul.f32 %v454_v59, %v383_v5 }
 0x1c4   :  { %v487_v14 = vadd.f32 %v479_v62, %v463_v3 }
 0x1c5   :  { %v486_v18 = vadd.f32 %v478_v8, %v462_v12  ;;  %v1335_v20 = vpop.f32.mrb[4].mxu0  ;;  %v1527_v22 = vpack.c.bf16 %v501_v63, %v500_v9 }
 0x1c6   :  { %v503_v23 = vmax.f32 %v487_v14, 0.0  ;;  %v465_v24 = vmul.f32 %v1335_v20, %v457_v13  ;;  %v393_v27 = vpop.f32.mrb[5].mxu0 }
 0x1c7   :  { %v502_v29 = vmax.f32 %v486_v18, 0.0  ;;  %v464_v30 = vmul.f32 %v456_v15, %v393_v27  ;;  %1528 = vmatprep.subr.bf16.mxu1 %v1527_v22 }
 0x1c8   :  { %v489_v34 = vadd.f32 %v481_v21, %v465_v24  ;;  %1530 = vmatpush3.bf16.msra.mxu1 %v1527_v22 }
 0x1c9   :  { %v488_v36 = vadd.f32 %v480_v28, %v464_v30  ;;  %v1338_v37 = vpop.f32.mrb[6].mxu0  ;;  %v1531_v39 = vpack.c.bf16 %v503_v23, %v502_v29 }
 0x1ca   :  { %v505_v42 = vmax.f32 %v489_v34, 0.0  ;;  %v467_v43 = vmul.f32 %v1338_v37, %v459_v31  ;;  %v403_v44 = vpop.f32.mrb[7].mxu0 }
 0x1cb   :  { %v504_v46 = vmax.f32 %v488_v36, 0.0  ;;  %v466_v47 = vmul.f32 %v458_v35, %v403_v44  ;;  %1532 = vmatprep.subr.bf16.mxu1 %v1531_v39 }
 0x1cc   :  { %v491_v48 = vadd.f32 %v483_v38, %v467_v43  ;;  %1534 = vmatpush3.bf16.msra.mxu1 %v1531_v39 }
 0x1cd   :  { %v490_v51 = vadd.f32 %v482_v45, %v466_v47  ;;  %v1341_v53 = vpop.f32.mrb[8].mxu0  ;;  %v1535_v54 = vpack.c.bf16 %v505_v42, %v504_v46 }
 0x1ce   :  { %v507_v56 = vmax.f32 %v491_v48, 0.0  ;;  %v469_v58 = vmul.f32 %v1341_v53, %v453_v49  ;;  %v413_v60 = vpop.f32.mrb[9].mxu0  ;;  %v517_v49 = vld [vmem:[%s2147_s5 + $0x8] sm:$0xff] }
 0x1cf   :  { %v506_v61 = vmax.f32 %v490_v51, 0.0  ;;  %v468_v63 = vmul.f32 %v452_v50, %v413_v60  ;;  %1536 = vmatprep.subr.bf16.mxu1 %v1535_v54 }
 0x1d0   :  { %v493_v3 = vadd.f32 %v477_v52, %v469_v58  ;;  %1538 = vmatpush3.bf16.msra.mxu1 %v1535_v54  ;;  %v518_v52 = vld [vmem:[%s2147_s5 + $0x10] sm:$0xff] }
 0x1d1   :  { %v492_v5 = vadd.f32 %v476_v55, %v468_v63  ;;  %v1344_v9 = vpop.f32.mrb[10].mxu0  ;;  %v1539_v12 = vpack.c.bf16 %v507_v56, %v506_v61 }
 0x1d2   :  { %v509_v14 = vmax.f32 %v493_v3, 0.0  ;;  %v471_v18 = vmul.f32 %v1344_v9, %v455_v57  ;;  %v423_v20 = vpop.f32.mrb[11].mxu0 }
 0x1d3   :  { %v508_v22 = vmax.f32 %v492_v5, 0.0  ;;  %v470_v23 = vmul.f32 %v454_v59, %v423_v20  ;;  %1540 = vmatprep.subr.bf16.mxu1 %v1539_v12 }
 0x1d4   :  { %v495_v24 = vadd.f32 %v479_v62, %v471_v18  ;;  %1542 = vmatpush3.bf16.msra.mxu1 %v1539_v12  ;;  %v519_v62 = vld [vmem:[%s2147_s5 + $0x18] sm:$0xff] }
 0x1d5   :  { %v494_v27 = vadd.f32 %v478_v8, %v470_v23  ;;  %v1347_v50 = vpop.f32.mrb[12].mxu0  ;;  %v1543_v29 = vpack.c.bf16 %v509_v14, %v508_v22  ;;  %v1972_v23 = vld [vmem:[%s2151_s7 + $0x8] sm:$0xff] }
 0x1d6   :  { %v511_v55 = vmax.f32 %v495_v24, 0.0  ;;  %v473_v30 = vmul.f32 %v1347_v50, %v457_v13  ;;  %v433_v57 = vpop.f32.mrb[13].mxu0  ;;  %v520_v13 = vld [vmem:[%s2147_s5 + $0x20] sm:$0xff] }
 0x1d7   :  { %v510_v34 = vmax.f32 %v494_v27, 0.0  ;;  %v472_v36 = vmul.f32 %v456_v15, %v433_v57  ;;  %1368 = vmatmul.mubr.msk.f32.vlgmr.msra.gmra.mrb[16].mxu1 %vm72_vm0, %v517_v49  ;;  %1544 = vmatprep.subr.bf16.mxu1 %v1543_v29  ;;  %v1977_v24 = vld [vmem:[%s2151_s7] sm:$0xff]  ;;  %v1982_v27 = vld [vmem:[%s2152_s8 + $0x8] sm:$0xff] }
 0x1d8   :  { %v497_v59 = vadd.f32 %v481_v21, %v473_v30  ;;  %1546 = vmatpush3.bf16.msra.mxu1 %v1543_v29  ;;  %1370 = vmatprep.mubr.msk.f32.mxu1 %vm72_vm0, %v518_v52  ;;  %v1994_v30 = vld [vmem:[%s2151_s7 + $0x18] sm:$0xff] }
 0x1d9   :  { %v496_v8 = vadd.f32 %v480_v28, %v472_v36  ;;  %v1350_v37 = vpop.f32.mrb[14].mxu0  ;;  %v1547_v39 = vpack.c.bf16 %v511_v55, %v510_v34  ;;  %v521_v28 = vld [vmem:[%s2147_s5 + $0x28] sm:$0xff]  ;;  %v2000_v34 = vld [vmem:[%s2151_s7 + $0x10] sm:$0xff] }
 0x1da   :  { %v513_v42 = vmax.f32 %v497_v59, 0.0  ;;  %v475_v15 = vmul.f32 %v1350_v37, %v459_v31  ;;  %v443_v43 = vpop.f32.mrb[15].mxu0  ;;  %v522_v31 = vld [vmem:[%s2147_s5 + $0x30] sm:$0xff] }
 0x1db   :  { %v512_v44 = vmax.f32 %v496_v8, 0.0  ;;  %v474_v46 = vmul.f32 %v458_v35, %v443_v43  ;;  %1371 = vmatmul.mubr.msk.f32.gmra.mrb[18].mxu1 %vm72_vm0, %v519_v62  ;;  %1548 = vmatprep.subr.bf16.mxu1 %v1547_v39  ;;  %v523_v35 = vld [vmem:[%s2147_s5 + $0x38] sm:$0xff]  ;;  %v2018_v43 = vld [vmem:[%s2151_s7 + $0x28] sm:$0xff] }
 0x1dc   :  { %v499_v21 = vadd.f32 %v483_v38, %v475_v15  ;;  %1550 = vmatpush3.bf16.msra.mxu1 %v1547_v39  ;;  %1373 = vmatprep.mubr.msk.f32.mxu1 %vm72_vm0, %v520_v13 }
 0x1dd   :  { %v498_v47 = vadd.f32 %v482_v45, %v474_v46  ;;  %v1551_v48 = vpack.c.bf16 %v513_v42, %v512_v44  ;;  %v999_v44 = vlaneseq }
 0x1de   :  { %v515_v51 = vmax.f32 %v499_v21, 0.0 }
 0x1df   :  { %v514_v53 = vmax.f32 %v498_v47, 0.0  ;;  %1374 = vmatmul.mubr.msk.f32.gmra.mrb[20].mxu1 %vm72_vm0, %v521_v28  ;;  %1552 = vmatprep.subr.bf16.mxu1 %v1551_v48 }
 0x1e0   :  { %1554 = vmatpush3.bf16.msra.mxu1 %v1551_v48  ;;  %1376 = vmatprep.mubr.msk.f32.mxu1 %vm72_vm0, %v522_v31 }
 0x1e1   :  { %v1555_v38 = vpack.c.bf16 %v515_v51, %v514_v53  ;;  %v2032_v51 = vld [vmem:[%s2152_s8 + $0x28] sm:$0xff] }
 0x1e3   :  { %1377 = vmatmul.mubr.msk.f32.gmra.mrb[22].mxu1 %vm72_vm0, %v523_v35  ;;  %1556 = vmatprep.subr.bf16.mxu1 %v1555_v38 }
 0x1e4   :  { %1558 = vmatpush3.bf16.msra.mxu1 %v1555_v38  ;;  %1395 = vmatprep.mubr.msk.f32.mxu1 %vm72_vm0, %v1832_v17 }
 0x1e7   :  { %1396 = vmatmul.mubr.msk.f32.vlgmr.msra.gmra.mrb[24].mxu1 %vm72_vm0, %v517_v49 }
 0x1e8   :  { %1398 = vmatprep.mubr.msk.f32.mxu1 %vm72_vm0, %v518_v52  ;;  %v1988_v52 = vld [vmem:[%s2152_s8] sm:$0xff] }
 0x1eb   :  { %1399 = vmatmul.mubr.msk.f32.gmra.mrb[26].mxu1 %vm72_vm0, %v519_v62  ;;  %v2006_v62 = vld [vmem:[%s2152_s8 + $0x18] sm:$0xff] }
 0x1ec   :  { %1401 = vmatprep.mubr.msk.f32.mxu1 %vm72_vm0, %v520_v13  ;;  %v2012_v13 = vld [vmem:[%s2152_s8 + $0x10] sm:$0xff] }
 0x1ef   :  { %1402 = vmatmul.mubr.msk.f32.gmra.mrb[28].mxu1 %vm72_vm0, %v521_v28  ;;  %v2025_v28 = vld [vmem:[%s2151_s7 + $0x20] sm:$0xff] }
 0x1f0   :  { %1404 = vmatprep.mubr.msk.f32.mxu1 %vm72_vm0, %v522_v31 }
 0x1f3   :  { %1405 = vmatmul.mubr.msk.f32.gmra.mrb[30].mxu1 %vm72_vm0, %v523_v35 }
 0x2aa   :  { %v1369_v45 = vpop.f32.mrb[16].mxu1 }
 0x2ab   :  { %v630_v54 = vpop.f32.mrb[17].mxu1 }
 0x2ac   :  { %1439 = vmatprep.mubr.f32.mxu0 %v630_v54  ;;  %v2050_v54 = vld [vmem:[%s2151_s7 + $0x38] sm:$0xff] }
 0x2ad   :  { %1440 = vmatmul.mubr.f32.vlgmr.msra.gmra.mrb[16].mxu0 %v1369_v45 }
 0x2ae   :  { %v1372_v56 = vpop.f32.mrb[18].mxu1 }
 0x2af   :  { %v640_v17 = vpop.f32.mrb[19].mxu1 }
 0x2b0   :  { %1442 = vmatprep.mubr.f32.mxu0 %v640_v17 }
 0x2b1   :  { %1443 = vmatmul.mubr.f32.gmra.mrb[18].mxu0 %v1372_v56  ;;  %v1000_v56 = vshrl.u32 %v999_v44, 7 }
 0x2b2   :  { %v1375_v58 = vpop.f32.mrb[20].mxu1 }
 0x2b3   :  { %v650_v60 = vpop.f32.mrb[21].mxu1 }
 0x2b4   :  { %1445 = vmatprep.mubr.f32.mxu0 %v650_v60  ;;  %v2057_v60 = vld [vmem:[%s2151_s7 + $0x30] sm:$0xff] }
 0x2b5   :  { %1446 = vmatmul.mubr.f32.gmra.mrb[20].mxu0 %v1375_v58 }
 0x2b6   :  { %v1378_v61 = vpop.f32.mrb[22].mxu1 }
 0x2b7   :  { %v660_v63 = vpop.f32.mrb[23].mxu1 }
 0x2b8   :  { %1448 = vmatprep.mubr.f32.mxu0 %v660_v63 }
 0x2b9   :  { %1449 = vmatmul.mubr.f32.gmra.mrb[22].mxu0 %v1378_v61 }
 0x2ba   :  { %v1397_v3 = vpop.f32.mrb[24].mxu1 }
 0x2bb   :  { %v735_v5 = vpop.f32.mrb[25].mxu1 }
 0x2bc   :  { %1451 = vmatprep.mubr.f32.mxu0 %v735_v5  ;;  %v950_v5 = vld [vmem:[%s2152_s8 + $0x38] sm:$0xff] }
 0x2bd   :  { %1452 = vmatmul.mubr.f32.gmra.mrb[24].mxu0 %v1397_v3 }
 0x2be   :  { %v1400_v9 = vpop.f32.mrb[26].mxu1 }
 0x2bf   :  { %v745_v12 = vpop.f32.mrb[27].mxu1 }
 0x2c0   :  { %1454 = vmatprep.mubr.f32.mxu0 %v745_v12 }
 0x2c1   :  { %1455 = vmatmul.mubr.f32.gmra.mrb[26].mxu0 %v1400_v9 }
 0x2c2   :  { %v1403_v14 = vpop.f32.mrb[28].mxu1 }
 0x2c3   :  { %v755_v18 = vpop.f32.mrb[29].mxu1 }
 0x2c4   :  { %1457 = vmatprep.mubr.f32.mxu0 %v755_v18  ;;  %v2074_v18 = vadd.s32 56, %v1000_v56 }
 0x2c5   :  { %1458 = vmatmul.mubr.f32.gmra.mrb[28].mxu0 %v1403_v14  ;;  %v949_v14 = vld [vmem:[%s2152_s8 + $0x30] sm:$0xff] }
 0x2c6   :  { %v1406_v20 = vpop.f32.mrb[30].mxu1  ;;  %vm1017_vm1 = vcmp.lt.s32.totalorder %v2074_v18, 57 }
 0x2c7   :  { %v765_v22 = vpop.f32.mrb[31].mxu1 }
 0x2c8   :  { %1460 = vmatprep.mubr.f32.mxu0 %v765_v22 }
 0x2c9   :  { %1461 = vmatmul.mubr.f32.gmra.mrb[30].mxu0 %v1406_v20 }
 0x380   :  { %v1441_v49 = vpop.f32.mrb[16].mxu0 }
 0x381   :  { %v928_v50 = vmul.f32 %v1441_v49, %v1972_v23  ;;  %v840_v29 = vpop.f32.mrb[17].mxu0 }
 0x382   :  { %v927_v55 = vmul.f32 %v1977_v24, %v840_v29 }
 0x383   :  { %v952_v57 = vadd.f32 %v1982_v27, %v928_v50 }
 0x384   :  { %v951_v36 = vadd.f32 %v1988_v52, %v927_v55  ;;  %v1444_v59 = vpop.f32.mrb[18].mxu0 }
 0x385   :  { %v968_v8 = vmax.f32 %v952_v57, 0.0  ;;  %v930_v37 = vmul.f32 %v1444_v59, %v1994_v30  ;;  %v850_v39 = vpop.f32.mrb[19].mxu0 }
 0x386   :  { %v967_v42 = vmax.f32 %v951_v36, 0.0  ;;  %v929_v15 = vmul.f32 %v2000_v34, %v850_v39 }
 0x387   :  { %v984_v46 = vadd.f32 %v968_v8, %v1649_v1  ;;  %v954_v21 = vadd.f32 %v2006_v62, %v930_v37 }
 0x388   :  { %v983_v47 = vadd.f32 %v967_v42, %v1644_v0  ;;  %v953_v48 = vadd.f32 %v2012_v13, %v929_v15  ;;  %v1447_v31 = vpop.f32.mrb[20].mxu0  ;;  %v2041_v0 = vld [vmem:[%s2152_s8 + $0x20] sm:$0xff] }
 0x389   :  { %1060 = vst [vmem:[%s2153_s9 + $0x8] sm:$0xff] %v984_v46  ;;  %v970_v1 = vmax.f32 %v954_v21, 0.0  ;;  %v932_v53 = vmul.f32 %v1447_v31, %v2018_v43  ;;  %v860_v35 = vpop.f32.mrb[21].mxu0 }
 0x38a   :  { %1059 = vst [vmem:[%s2153_s9] sm:$0xff] %v983_v47  ;;  %v969_v38 = vmax.f32 %v953_v48, 0.0  ;;  %v931_v45 = vmul.f32 %v2025_v28, %v860_v35 }
 0x38b   :  { %v986_v17 = vadd.f32 %v970_v1, %v1661_v4  ;;  %v956_v58 = vadd.f32 %v2032_v51, %v932_v53 }
 0x38c   :  { %v985_v61 = vadd.f32 %v969_v38, %v1654_v2  ;;  %v955_v63 = vadd.f32 %v2041_v0, %v931_v45  ;;  %v1450_v3 = vpop.f32.mrb[22].mxu0 }
 0x38d   :  { %1062 = vst [vmem:[%s2153_s9 + $0x18] sm:$0xff] %v986_v17  ;;  %v972_v4 = vmax.f32 %v956_v58, 0.0  ;;  %v934_v9 = vmul.f32 %v1450_v3, %v2050_v54  ;;  %v870_v12 = vpop.f32.mrb[23].mxu0 }
 0x38e   :  { %1061 = vst [vmem:[%s2153_s9 + $0x10] sm:$0xff] %v985_v61  ;;  %v971_v2 = vmax.f32 %v955_v63, 0.0  ;;  %v933_v20 = vmul.f32 %v2057_v60, %v870_v12 }
 0x38f   :  { %v988_v22 = vadd.f32 %v972_v4, %v1673_v7  ;;  %v958_v49 = vadd.f32 %v950_v5, %v934_v9 }
 0x390   :  { %v987_v50 = vadd.f32 %v971_v2, %v1668_v6  ;;  %v957_v29 = vadd.f32 %v949_v14, %v933_v20  ;;  %v1453_v55 = vpop.f32.mrb[24].mxu0 }
 0x391   :  { %1064 = vst [vmem:[%s2153_s9 + $0x28] sm:$0xff] %v988_v22  ;;  %v974_v57 = vmax.f32 %v958_v49, 0.0  ;;  %v936_v36 = vmul.f32 %v1453_v55, %v1972_v23  ;;  %v880_v59 = vpop.f32.mrb[25].mxu0 }
 0x392   :  { %1063 = vst [vmem:[%s2153_s9 + $0x20] sm:$0xff] %v987_v50  ;;  %v973_v7 = vmax.f32 %v957_v29, 0.0  ;;  %v935_v8 = vmul.f32 %v1977_v24, %v880_v59 }
 0x393   :  { %v990_v6 = vadd.f32 %v974_v57, %v1692_v11  ;;  %v960_v37 = vadd.f32 %v1982_v27, %v936_v36 }
 0x394   :  { %v989_v39 = vadd.f32 %v973_v7, %v1687_v10  ;;  %v959_v42 = vadd.f32 %v1988_v52, %v935_v8  ;;  %v1456_v15 = vpop.f32.mrb[26].mxu0 }
 0x395   :  { %v1050_v23 = vsel %vm1017_vm1, %v990_v6, 0.0  ;;  %v976_v44 = vmax.f32 %v960_v37, 0.0  ;;  %v938_v46 = vmul.f32 %v1456_v15, %v1994_v30  ;;  %v890_v21 = vpop.f32.mrb[27].mxu0 }
 0x396   :  { %1066 = vst [vmem:[%s2153_s9 + $0x38] sm:$0xff] %v1050_v23  ;;  %1065 = vst [vmem:[%s2153_s9 + $0x30] sm:$0xff] %v989_v39  ;;  %v975_v11 = vmax.f32 %v959_v42, 0.0  ;;  %v937_v10 = vmul.f32 %v2000_v34, %v890_v21 }
 0x397   :  { %v992_v24 = vadd.f32 %v976_v44, %v1716_v19  ;;  %v962_v27 = vadd.f32 %v2006_v62, %v938_v46 }
 0x398   :  { %v991_v52 = vadd.f32 %v975_v11, %v1708_v16  ;;  %v961_v30 = vadd.f32 %v2012_v13, %v937_v10  ;;  %v1459_v47 = vpop.f32.mrb[28].mxu0 }
 0x399   :  { %1068 = vst [vmem:[%s2153_s9 + $0x48] sm:$0xff] %v992_v24  ;;  %v978_v48 = vmax.f32 %v962_v27, 0.0  ;;  %v940_v31 = vmul.f32 %v1459_v47, %v2018_v43  ;;  %v900_v1 = vpop.f32.mrb[29].mxu0 }
 0x39a   :  { %1067 = vst [vmem:[%s2153_s9 + $0x40] sm:$0xff] %v991_v52  ;;  %v977_v19 = vmax.f32 %v961_v30, 0.0  ;;  %v939_v34 = vmul.f32 %v2025_v28, %v900_v1 }
 0x39b   :  { %v994_v16 = vadd.f32 %v978_v48, %v1734_v26  ;;  %v964_v62 = vadd.f32 %v2032_v51, %v940_v31 }
 0x39c   :  { %v993_v13 = vadd.f32 %v977_v19, %v1729_v25  ;;  %v963_v53 = vadd.f32 %v2041_v0, %v939_v34  ;;  %v1462_v35 = vpop.f32.mrb[30].mxu0 }
 0x39d   :  { %1070 = vst [vmem:[%s2153_s9 + $0x58] sm:$0xff] %v994_v16  ;;  %v980_v43 = vmax.f32 %v964_v62, 0.0  ;;  %v942_v38 = vmul.f32 %v1462_v35, %v2050_v54  ;;  %v910_v45 = vpop.f32.mrb[31].mxu0 }
 0x39e   :  { %1069 = vst [vmem:[%s2153_s9 + $0x50] sm:$0xff] %v993_v13  ;;  %v979_v26 = vmax.f32 %v963_v53, 0.0  ;;  %v941_v28 = vmul.f32 %v2057_v60, %v910_v45 }
 0x39f   :  { %v996_v25 = vadd.f32 %v980_v43, %v1758_v33  ;;  %v966_v51 = vadd.f32 %v950_v5, %v942_v38 }
 0x3a0   :  { %v995_v0 = vadd.f32 %v979_v26, %v1753_v32  ;;  %v965_v56 = vadd.f32 %v949_v14, %v941_v28 }
 0x3a1   :  { %1072 = vst [vmem:[%s2153_s9 + $0x68] sm:$0xff] %v996_v25  ;;  %v982_v17 = vmax.f32 %v966_v51, 0.0 }
 0x3a2   :  { %1071 = vst [vmem:[%s2153_s9 + $0x60] sm:$0xff] %v995_v0  ;;  %v981_v54 = vmax.f32 %v965_v56, 0.0 }
 0x3a3   :  { %v998_v58 = vadd.f32 %v982_v17, %v1784_v41 }
 0x3a4   :  { %v997_v60 = vadd.f32 %v981_v54, %v1779_v40 }
 0x3a5   :  { %v1058_v33 = vsel %vm1017_vm1, %v998_v58, 0.0 }
 0x3a6   :  { %1074 = vst [vmem:[%s2153_s9 + $0x78] sm:$0xff] %v1058_v33  ;;  %1073 = vst [vmem:[%s2153_s9 + $0x70] sm:$0xff] %v997_v60 }

// kernel: fwd.6
= control target key start
LH: loop header
LB: loop body
LE: loop exit
PB: predicated region body
PF: predicated region fallthrough
CT: control target
= control target key end

     0   :  { %vm57_vm0 = vcmask 523264   ;;  %s1072_s0 = inlined_call_operand.vmem [shape: f32[2,64,128], index: 0, kind: input, shape index: {}]   ;;  %s1073_s1 = inlined_call_operand.vmem [shape: f32[64,64], index: 1, kind: input, shape index: {}]   ;;  %s1074_s2 = inlined_call_operand.vmem [shape: f32[128,128], index: 2, kind: input, shape index: {}]   ;;  %s1075_s3 = inlined_call_operand.vmem [shape: f32[1,128], index: 3, kind: input, shape index: {}]   ;;  %s1076_s4 = inlined_call_operand.vmem [shape: f32[2,64,128], index: 4, kind: output, shape index: {}]  }
   0x1   :  { %v41_v0 = vld [vmem:[%s1072_s0] sm:$0xff]  ;;  %v42_v1 = vld [vmem:[%s1072_s0 + $0x8] sm:$0xff]  ;;  %v43_v2 = vld [vmem:[%s1072_s0 + $0x10] sm:$0xff] }
   0x2   :  { %v733_v3 = vpack.c.bf16 %v42_v1, %v41_v0  ;;  %v44_v4 = vld [vmem:[%s1072_s0 + $0x18] sm:$0xff]  ;;  %v45_v6 = vld [vmem:[%s1072_s0 + $0x20] sm:$0xff]  ;;  %v46_v7 = vld [vmem:[%s1072_s0 + $0x28] sm:$0xff] }
   0x3   :  { %v737_v5 = vpack.c.bf16 %v44_v4, %v43_v2  ;;  %v843_v8 = vld [vmem:[%s1073_s1] sm:$0xff]  ;;  %v741_v9 = vpack.c.bf16 %v46_v7, %v45_v6  ;;  %v47_v10 = vld [vmem:[%s1072_s0 + $0x30] sm:$0xff]  ;;  %v48_v11 = vld [vmem:[%s1072_s0 + $0x38] sm:$0xff] }
   0x4   :  { %734 = vmatprep.subr.bf16.mxu1 %v733_v3  ;;  %637 = vmatprep.mubr.msk.f32.mxu1 %vm57_vm0, %v843_v8  ;;  %v25_v12 = vld [vmem:[%s1074_s2] sm:$0xff]  ;;  %v26_v13 = vld [vmem:[%s1074_s2 + $0x8] sm:$0xff]  ;;  %v27_v14 = vld [vmem:[%s1074_s2 + $0x10] sm:$0xff]  ;;  %v745_v15 = vpack.c.bf16 %v48_v11, %v47_v10 }
   0x5   :  { %736 = vmatpush3.bf16.msra.mxu1 %v733_v3  ;;  %v49_v16 = vld [vmem:[%s1072_s0 + $0x40] sm:$0xff]  ;;  %v765_v17 = vpack.c.bf16 %v26_v13, %v25_v12  ;;  %v28_v18 = vld [vmem:[%s1074_s2 + $0x18] sm:$0xff]  ;;  %v50_v19 = vld [vmem:[%s1072_s0 + $0x48] sm:$0xff] }
   0x6   :  { %738 = vmatprep.subr.bf16.mxu1 %v737_v5  ;;  %v769_v20 = vpack.c.bf16 %v28_v18, %v27_v14  ;;  %v29_v21 = vld [vmem:[%s1074_s2 + $0x20] sm:$0xff]  ;;  %v30_v22 = vld [vmem:[%s1074_s2 + $0x28] sm:$0xff]  ;;  %v749_v23 = vpack.c.bf16 %v50_v19, %v49_v16  ;;  %v51_v25 = vld [vmem:[%s1072_s0 + $0x50] sm:$0xff] }
   0x7   :  { %766 = vmatprep.subr.bf16.mxu0 %v765_v17  ;;  %v773_v24 = vpack.c.bf16 %v30_v22, %v29_v21  ;;  %v52_v26 = vld [vmem:[%s1072_s0 + $0x58] sm:$0xff]  ;;  %v31_v27 = vld [vmem:[%s1074_s2 + $0x30] sm:$0xff]  ;;  %v18_v29 = vld [vmem:[%s1073_s1 + $0x8] sm:$0xff] }
   0x8   :  { %768 = vmatpush3.bf16.msra.mxu0 %v765_v17  ;;  %v32_v28 = vld [vmem:[%s1074_s2 + $0x38] sm:$0xff]  ;;  %v19_v30 = vld [vmem:[%s1073_s1 + $0x10] sm:$0xff]  ;;  %v753_v31 = vpack.c.bf16 %v52_v26, %v51_v25  ;;  %v53_v32 = vld [vmem:[%s1072_s0 + $0x60] sm:$0xff] }
   0x9   :  { %740 = vmatpush3.bf16.msra.mxu1 %v737_v5  ;;  %770 = vmatprep.subr.bf16.mxu0 %v769_v20  ;;  %v54_v33 = vld [vmem:[%s1072_s0 + $0x68] sm:$0xff]  ;;  %v777_v34 = vpack.c.bf16 %v32_v28, %v31_v27  ;;  %v33_v35 = vld [vmem:[%s1074_s2 + $0x40] sm:$0xff]  ;;  %v20_v37 = vld [vmem:[%s1073_s1 + $0x18] sm:$0xff] }
   0xa   :  { %742 = vmatprep.subr.bf16.mxu1 %v741_v9  ;;  %v34_v36 = vld [vmem:[%s1074_s2 + $0x48] sm:$0xff]  ;;  %v21_v38 = vld [vmem:[%s1073_s1 + $0x20] sm:$0xff]  ;;  %v757_v39 = vpack.c.bf16 %v54_v33, %v53_v32  ;;  %v55_v40 = vld [vmem:[%s1072_s0 + $0x70] sm:$0xff] }
   0xb   :  { %v56_v41 = vld [vmem:[%s1072_s0 + $0x78] sm:$0xff]  ;;  %v781_v42 = vpack.c.bf16 %v34_v36, %v33_v35  ;;  %v35_v43 = vld [vmem:[%s1074_s2 + $0x50] sm:$0xff]  ;;  %v22_v45 = vld [vmem:[%s1073_s1 + $0x28] sm:$0xff] }
   0xc   :  { %772 = vmatpush3.bf16.msra.mxu0 %v769_v20  ;;  %v36_v44 = vld [vmem:[%s1074_s2 + $0x58] sm:$0xff]  ;;  %v23_v46 = vld [vmem:[%s1073_s1 + $0x30] sm:$0xff]  ;;  %v761_v47 = vpack.c.bf16 %v56_v41, %v55_v40  ;;  %v37_v49 = vld [vmem:[%s1074_s2 + $0x60] sm:$0xff] }
   0xd   :  { %744 = vmatpush3.bf16.msra.mxu1 %v741_v9  ;;  %774 = vmatprep.subr.bf16.mxu0 %v773_v24  ;;  %v785_v48 = vpack.c.bf16 %v36_v44, %v35_v43  ;;  %v38_v50 = vld [vmem:[%s1074_s2 + $0x68] sm:$0xff]  ;;  %v24_v51 = vld [vmem:[%s1073_s1 + $0x38] sm:$0xff]  ;;  %v39_v53 = vld [vmem:[%s1074_s2 + $0x70] sm:$0xff] }
   0xe   :  { %746 = vmatprep.subr.bf16.mxu1 %v745_v15  ;;  %v789_v52 = vpack.c.bf16 %v38_v50, %v37_v49  ;;  %v40_v54 = vld [vmem:[%s1074_s2 + $0x78] sm:$0xff]  ;;  %v967_v10 = vld [vmem:[%s1075_s3] ss:$0 sm:$0xff] }
   0xf   :  { %v793_v55 = vpack.c.bf16 %v40_v54, %v39_v53 }
  0x10   :  { %776 = vmatpush3.bf16.msra.mxu0 %v773_v24 }
  0x11   :  { %748 = vmatpush3.bf16.msra.mxu1 %v745_v15  ;;  %778 = vmatprep.subr.bf16.mxu0 %v777_v34 }
  0x12   :  { %750 = vmatprep.subr.bf16.mxu1 %v749_v23 }
  0x14   :  { %638 = vmatmul.mubr.msk.f32.vlgmr.msra.gmra.mrb[0].mxu1 %vm57_vm0, %v18_v29  ;;  %780 = vmatpush3.bf16.msra.mxu0 %v777_v34 }
  0x15   :  { %752 = vmatpush3.bf16.msra.mxu1 %v749_v23  ;;  %640 = vmatprep.mubr.msk.f32.mxu1 %vm57_vm0, %v19_v30 }
  0x16   :  { %754 = vmatprep.subr.bf16.mxu1 %v753_v31  ;;  %782 = vmatprep.subr.bf16.mxu0 %v781_v42 }
  0x18   :  { %641 = vmatmul.mubr.msk.f32.gmra.mrb[2].mxu1 %vm57_vm0, %v20_v37  ;;  %784 = vmatpush3.bf16.msra.mxu0 %v781_v42 }
  0x19   :  { %756 = vmatpush3.bf16.msra.mxu1 %v753_v31  ;;  %643 = vmatprep.mubr.msk.f32.mxu1 %vm57_vm0, %v21_v38 }
  0x1a   :  { %758 = vmatprep.subr.bf16.mxu1 %v757_v39  ;;  %786 = vmatprep.subr.bf16.mxu0 %v785_v48 }
  0x1c   :  { %644 = vmatmul.mubr.msk.f32.gmra.mrb[4].mxu1 %vm57_vm0, %v22_v45  ;;  %788 = vmatpush3.bf16.msra.mxu0 %v785_v48 }
  0x1d   :  { %760 = vmatpush3.bf16.msra.mxu1 %v757_v39  ;;  %646 = vmatprep.mubr.msk.f32.mxu1 %vm57_vm0, %v23_v46 }
  0x1e   :  { %762 = vmatprep.subr.bf16.mxu1 %v761_v47  ;;  %790 = vmatprep.subr.bf16.mxu0 %v789_v52 }
  0x20   :  { %647 = vmatmul.mubr.msk.f32.gmra.mrb[6].mxu1 %vm57_vm0, %v24_v51  ;;  %792 = vmatpush3.bf16.msra.mxu0 %v789_v52 }
  0x21   :  { %764 = vmatpush3.bf16.msra.mxu1 %v761_v47  ;;  %665 = vmatprep.mubr.msk.f32.mxu1 %vm57_vm0, %v843_v8  ;;  %v460_v8 = vlaneseq }
  0x22   :  { %794 = vmatprep.subr.bf16.mxu0 %v793_v55 }
  0x23   :  { %v962_v9 = vand.u32 127, %v460_v8  ;;  %v461_v14 = vshrl.u32 %v460_v8, 7 }
  0x24   :  { %666 = vmatmul.mubr.msk.f32.vlgmr.msra.gmra.mrb[8].mxu1 %vm57_vm0, %v18_v29  ;;  %796 = vmatpush3.bf16.msra.mxu0 %v793_v55 }
  0x25   :  { %668 = vmatprep.mubr.msk.f32.mxu1 %vm57_vm0, %v19_v30  ;;  %vm479_vm1 = vcmp.lt.s32.totalorder %v962_v9, 25  ;;  %v468_v21 = vadd.s32 56, %v461_v14 }
  0x27   :  { %vm478_vm2 = vcmp.lt.s32.totalorder %v468_v21, 57 }
  0x28   :  { %669 = vmatmul.mubr.msk.f32.gmra.mrb[10].mxu1 %vm57_vm0, %v20_v37  ;;  %vm1005_vm3 = vmand %vm478_vm2, %vm479_vm1 }
  0x29   :  { %671 = vmatprep.mubr.msk.f32.mxu1 %vm57_vm0, %v21_v38 }
  0x2c   :  { %672 = vmatmul.mubr.msk.f32.gmra.mrb[12].mxu1 %vm57_vm0, %v22_v45 }
  0x2d   :  { %674 = vmatprep.mubr.msk.f32.mxu1 %vm57_vm0, %v23_v46 }
  0x30   :  { %675 = vmatmul.mubr.msk.f32.gmra.mrb[14].mxu1 %vm57_vm0, %v24_v51 }
  0xe7   :  { %v639_v56 = vpop.f32.mrb[0].mxu1 }
  0xe8   :  { %v148_v57 = vpop.f32.mrb[1].mxu1 }
  0xe9   :  { %709 = vmatprep.mubr.f32.mxu0 %v148_v57 }
  0xea   :  { %710 = vmatmul.mubr.f32.vlgmr.msra.gmra.mrb[0].mxu0 %v639_v56 }
  0xeb   :  { %v642_v58 = vpop.f32.mrb[2].mxu1 }
  0xec   :  { %v158_v59 = vpop.f32.mrb[3].mxu1 }
  0xed   :  { %712 = vmatprep.mubr.f32.mxu0 %v158_v59 }
  0xee   :  { %713 = vmatmul.mubr.f32.gmra.mrb[2].mxu0 %v642_v58 }
  0xef   :  { %v645_v60 = vpop.f32.mrb[4].mxu1 }
  0xf0   :  { %v168_v61 = vpop.f32.mrb[5].mxu1 }
  0xf1   :  { %715 = vmatprep.mubr.f32.mxu0 %v168_v61 }
  0xf2   :  { %716 = vmatmul.mubr.f32.gmra.mrb[4].mxu0 %v645_v60 }
  0xf3   :  { %v648_v62 = vpop.f32.mrb[6].mxu1 }
  0xf4   :  { %v178_v63 = vpop.f32.mrb[7].mxu1 }
  0xf5   :  { %718 = vmatprep.mubr.f32.mxu0 %v178_v63 }
  0xf6   :  { %719 = vmatmul.mubr.f32.gmra.mrb[6].mxu0 %v648_v62 }
  0xf7   :  { %v667_v0 = vpop.f32.mrb[8].mxu1 }
  0xf8   :  { %v253_v1 = vpop.f32.mrb[9].mxu1 }
  0xf9   :  { %721 = vmatprep.mubr.f32.mxu0 %v253_v1 }
  0xfa   :  { %722 = vmatmul.mubr.f32.gmra.mrb[8].mxu0 %v667_v0 }
  0xfb   :  { %v670_v2 = vpop.f32.mrb[10].mxu1 }
  0xfc   :  { %v263_v3 = vpop.f32.mrb[11].mxu1 }
  0xfd   :  { %724 = vmatprep.mubr.f32.mxu0 %v263_v3 }
  0xfe   :  { %725 = vmatmul.mubr.f32.gmra.mrb[10].mxu0 %v670_v2 }
  0xff   :  { %v673_v4 = vpop.f32.mrb[12].mxu1 }
 0x100   :  { %v273_v5 = vpop.f32.mrb[13].mxu1 }
 0x101   :  { %727 = vmatprep.mubr.f32.mxu0 %v273_v5 }
 0x102   :  { %728 = vmatmul.mubr.f32.gmra.mrb[12].mxu0 %v673_v4 }
 0x103   :  { %v676_v6 = vpop.f32.mrb[14].mxu1 }
 0x104   :  { %v283_v7 = vpop.f32.mrb[15].mxu1 }
 0x105   :  { %730 = vmatprep.mubr.f32.mxu0 %v283_v7 }
 0x106   :  { %731 = vmatmul.mubr.f32.gmra.mrb[14].mxu0 %v676_v6 }
 0x1bd   :  { %v711_v11 = vpop.f32.mrb[0].mxu0 }
 0x1be   :  { %v445_v12 = vadd.f32 %v711_v11, %v967_v10  ;;  %v358_v13 = vpop.f32.mrb[1].mxu0 }
 0x1bf   :  { %v444_v15 = vadd.f32 %v967_v10, %v358_v13 }
 0x1c0   :  { %v505_v16 = vsel %vm479_vm1, %v445_v12, 0.0 }
 0x1c1   :  { %521 = vst [vmem:[%s1076_s4 + $0x8] sm:$0xff] %v505_v16  ;;  %v504_v17 = vsel %vm479_vm1, %v444_v15, 0.0  ;;  %v714_v18 = vpop.f32.mrb[2].mxu0 }
 0x1c2   :  { %520 = vst [vmem:[%s1076_s4] sm:$0xff] %v504_v17  ;;  %v447_v19 = vadd.f32 %v714_v18, %v967_v10  ;;  %v368_v20 = vpop.f32.mrb[3].mxu0 }
 0x1c3   :  { %v446_v22 = vadd.f32 %v967_v10, %v368_v20 }
 0x1c4   :  { %v507_v23 = vsel %vm479_vm1, %v447_v19, 0.0 }
 0x1c5   :  { %523 = vst [vmem:[%s1076_s4 + $0x18] sm:$0xff] %v507_v23  ;;  %v506_v24 = vsel %vm479_vm1, %v446_v22, 0.0  ;;  %v717_v25 = vpop.f32.mrb[4].mxu0 }
 0x1c6   :  { %522 = vst [vmem:[%s1076_s4 + $0x10] sm:$0xff] %v506_v24  ;;  %v449_v26 = vadd.f32 %v717_v25, %v967_v10  ;;  %v378_v27 = vpop.f32.mrb[5].mxu0 }
 0x1c7   :  { %v448_v28 = vadd.f32 %v967_v10, %v378_v27 }
 0x1c8   :  { %v509_v29 = vsel %vm479_vm1, %v449_v26, 0.0 }
 0x1c9   :  { %525 = vst [vmem:[%s1076_s4 + $0x28] sm:$0xff] %v509_v29  ;;  %v508_v30 = vsel %vm479_vm1, %v448_v28, 0.0  ;;  %v720_v31 = vpop.f32.mrb[6].mxu0 }
 0x1ca   :  { %524 = vst [vmem:[%s1076_s4 + $0x20] sm:$0xff] %v508_v30  ;;  %v451_v33 = vadd.f32 %v720_v31, %v967_v10  ;;  %v388_v34 = vpop.f32.mrb[7].mxu0 }
 0x1cb   :  { %v450_v35 = vadd.f32 %v967_v10, %v388_v34 }
 0x1cc   :  { %v511_v36 = vsel %vm1005_vm3, %v451_v33, 0.0 }
 0x1cd   :  { %527 = vst [vmem:[%s1076_s4 + $0x38] sm:$0xff] %v511_v36  ;;  %v510_v37 = vsel %vm479_vm1, %v450_v35, 0.0  ;;  %v723_v38 = vpop.f32.mrb[8].mxu0 }
 0x1ce   :  { %526 = vst [vmem:[%s1076_s4 + $0x30] sm:$0xff] %v510_v37  ;;  %v453_v39 = vadd.f32 %v723_v38, %v967_v10  ;;  %v398_v40 = vpop.f32.mrb[9].mxu0 }
 0x1cf   :  { %v452_v41 = vadd.f32 %v967_v10, %v398_v40 }
 0x1d0   :  { %v513_v42 = vsel %vm479_vm1, %v453_v39, 0.0 }
 0x1d1   :  { %529 = vst [vmem:[%s1076_s4 + $0x48] sm:$0xff] %v513_v42  ;;  %v512_v43 = vsel %vm479_vm1, %v452_v41, 0.0  ;;  %v726_v44 = vpop.f32.mrb[10].mxu0 }
 0x1d2   :  { %528 = vst [vmem:[%s1076_s4 + $0x40] sm:$0xff] %v512_v43  ;;  %v455_v45 = vadd.f32 %v726_v44, %v967_v10  ;;  %v408_v46 = vpop.f32.mrb[11].mxu0 }
 0x1d3   :  { %v454_v47 = vadd.f32 %v967_v10, %v408_v46 }
 0x1d4   :  { %v515_v48 = vsel %vm479_vm1, %v455_v45, 0.0 }
 0x1d5   :  { %531 = vst [vmem:[%s1076_s4 + $0x58] sm:$0xff] %v515_v48  ;;  %v514_v49 = vsel %vm479_vm1, %v454_v47, 0.0  ;;  %v729_v50 = vpop.f32.mrb[12].mxu0 }
 0x1d6   :  { %530 = vst [vmem:[%s1076_s4 + $0x50] sm:$0xff] %v514_v49  ;;  %v457_v51 = vadd.f32 %v729_v50, %v967_v10  ;;  %v418_v52 = vpop.f32.mrb[13].mxu0 }
 0x1d7   :  { %v456_v53 = vadd.f32 %v967_v10, %v418_v52 }
 0x1d8   :  { %v517_v54 = vsel %vm479_vm1, %v457_v51, 0.0 }
 0x1d9   :  { %533 = vst [vmem:[%s1076_s4 + $0x68] sm:$0xff] %v517_v54  ;;  %v516_v55 = vsel %vm479_vm1, %v456_v53, 0.0  ;;  %v732_v56 = vpop.f32.mrb[14].mxu0 }
 0x1da   :  { %532 = vst [vmem:[%s1076_s4 + $0x60] sm:$0xff] %v516_v55  ;;  %v459_v57 = vadd.f32 %v732_v56, %v967_v10  ;;  %v428_v58 = vpop.f32.mrb[15].mxu0 }
 0x1db   :  { %v458_v59 = vadd.f32 %v967_v10, %v428_v58 }
 0x1dc   :  { %v519_v60 = vsel %vm1005_vm3, %v459_v57, 0.0 }
 0x1dd   :  { %535 = vst [vmem:[%s1076_s4 + $0x78] sm:$0xff] %v519_v60  ;;  %v518_v61 = vsel %vm479_vm1, %v458_v59, 0.0 }
 0x1de   :  { %534 = vst [vmem:[%s1076_s4 + $0x70] sm:$0xff] %v518_v61 }

// kernel: fwd.7
= control target key start
LH: loop header
LB: loop body
LE: loop exit
PB: predicated region body
PF: predicated region fallthrough
CT: control target
= control target key end

     0   :  { %vm57_vm0 = vcmask 523264   ;;  %s1168_s0 = inlined_call_operand.vmem [shape: f32[2,64,128], index: 0, kind: input, shape index: {}]   ;;  %s1169_s1 = inlined_call_operand.vmem [shape: f32[64,64], index: 1, kind: input, shape index: {}]   ;;  %s1170_s2 = inlined_call_operand.vmem [shape: f32[128,128], index: 2, kind: input, shape index: {}]   ;;  %s1171_s3 = inlined_call_operand.vmem [shape: f32[1,128], index: 3, kind: input, shape index: {}]   ;;  %s1172_s4 = inlined_call_operand.vmem [shape: f32[2,64,128], index: 4, kind: output, shape index: {}]  }
   0x1   :  { %v41_v0 = vld [vmem:[%s1168_s0] sm:$0xff]  ;;  %v42_v1 = vld [vmem:[%s1168_s0 + $0x8] sm:$0xff]  ;;  %v43_v2 = vld [vmem:[%s1168_s0 + $0x10] sm:$0xff] }
   0x2   :  { %v797_v3 = vpack.c.bf16 %v42_v1, %v41_v0  ;;  %v44_v4 = vld [vmem:[%s1168_s0 + $0x18] sm:$0xff]  ;;  %v45_v6 = vld [vmem:[%s1168_s0 + $0x20] sm:$0xff]  ;;  %v46_v7 = vld [vmem:[%s1168_s0 + $0x28] sm:$0xff] }
   0x3   :  { %v801_v5 = vpack.c.bf16 %v44_v4, %v43_v2  ;;  %v939_v8 = vld [vmem:[%s1169_s1] sm:$0xff]  ;;  %v805_v9 = vpack.c.bf16 %v46_v7, %v45_v6  ;;  %v47_v10 = vld [vmem:[%s1168_s0 + $0x30] sm:$0xff]  ;;  %v48_v11 = vld [vmem:[%s1168_s0 + $0x38] sm:$0xff] }
   0x4   :  { %798 = vmatprep.subr.bf16.mxu1 %v797_v3  ;;  %701 = vmatprep.mubr.msk.f32.mxu1 %vm57_vm0, %v939_v8  ;;  %v25_v12 = vld [vmem:[%s1170_s2] sm:$0xff]  ;;  %v26_v13 = vld [vmem:[%s1170_s2 + $0x8] sm:$0xff]  ;;  %v27_v14 = vld [vmem:[%s1170_s2 + $0x10] sm:$0xff]  ;;  %v809_v15 = vpack.c.bf16 %v48_v11, %v47_v10 }
   0x5   :  { %800 = vmatpush3.bf16.msra.mxu1 %v797_v3  ;;  %v49_v16 = vld [vmem:[%s1168_s0 + $0x40] sm:$0xff]  ;;  %v829_v17 = vpack.c.bf16 %v26_v13, %v25_v12  ;;  %v28_v18 = vld [vmem:[%s1170_s2 + $0x18] sm:$0xff]  ;;  %v50_v19 = vld [vmem:[%s1168_s0 + $0x48] sm:$0xff] }
   0x6   :  { %802 = vmatprep.subr.bf16.mxu1 %v801_v5  ;;  %v833_v20 = vpack.c.bf16 %v28_v18, %v27_v14  ;;  %v29_v21 = vld [vmem:[%s1170_s2 + $0x20] sm:$0xff]  ;;  %v30_v22 = vld [vmem:[%s1170_s2 + $0x28] sm:$0xff]  ;;  %v813_v23 = vpack.c.bf16 %v50_v19, %v49_v16  ;;  %v51_v25 = vld [vmem:[%s1168_s0 + $0x50] sm:$0xff] }
   0x7   :  { %830 = vmatprep.subr.bf16.mxu0 %v829_v17  ;;  %v837_v24 = vpack.c.bf16 %v30_v22, %v29_v21  ;;  %v52_v26 = vld [vmem:[%s1168_s0 + $0x58] sm:$0xff]  ;;  %v31_v27 = vld [vmem:[%s1170_s2 + $0x30] sm:$0xff]  ;;  %v18_v29 = vld [vmem:[%s1169_s1 + $0x8] sm:$0xff]  ;;  %v524_v22 = vlaneseq }
   0x8   :  { %832 = vmatpush3.bf16.msra.mxu0 %v829_v17  ;;  %v32_v28 = vld [vmem:[%s1170_s2 + $0x38] sm:$0xff]  ;;  %v19_v30 = vld [vmem:[%s1169_s1 + $0x10] sm:$0xff]  ;;  %v817_v31 = vpack.c.bf16 %v52_v26, %v51_v25  ;;  %v53_v32 = vld [vmem:[%s1168_s0 + $0x60] sm:$0xff] }
   0x9   :  { %804 = vmatpush3.bf16.msra.mxu1 %v801_v5  ;;  %834 = vmatprep.subr.bf16.mxu0 %v833_v20  ;;  %v54_v33 = vld [vmem:[%s1168_s0 + $0x68] sm:$0xff]  ;;  %v841_v34 = vpack.c.bf16 %v32_v28, %v31_v27  ;;  %v33_v35 = vld [vmem:[%s1170_s2 + $0x40] sm:$0xff]  ;;  %v20_v37 = vld [vmem:[%s1169_s1 + $0x18] sm:$0xff] }
   0xa   :  { %806 = vmatprep.subr.bf16.mxu1 %v805_v9  ;;  %v34_v36 = vld [vmem:[%s1170_s2 + $0x48] sm:$0xff]  ;;  %v21_v38 = vld [vmem:[%s1169_s1 + $0x20] sm:$0xff]  ;;  %v821_v39 = vpack.c.bf16 %v54_v33, %v53_v32  ;;  %v55_v40 = vld [vmem:[%s1168_s0 + $0x70] sm:$0xff] }
   0xb   :  { %v56_v41 = vld [vmem:[%s1168_s0 + $0x78] sm:$0xff]  ;;  %v845_v42 = vpack.c.bf16 %v34_v36, %v33_v35  ;;  %v35_v43 = vld [vmem:[%s1170_s2 + $0x50] sm:$0xff]  ;;  %v22_v45 = vld [vmem:[%s1169_s1 + $0x28] sm:$0xff] }
   0xc   :  { %836 = vmatpush3.bf16.msra.mxu0 %v833_v20  ;;  %v36_v44 = vld [vmem:[%s1170_s2 + $0x58] sm:$0xff]  ;;  %v23_v46 = vld [vmem:[%s1169_s1 + $0x30] sm:$0xff]  ;;  %v825_v47 = vpack.c.bf16 %v56_v41, %v55_v40  ;;  %v37_v49 = vld [vmem:[%s1170_s2 + $0x60] sm:$0xff] }
   0xd   :  { %808 = vmatpush3.bf16.msra.mxu1 %v805_v9  ;;  %838 = vmatprep.subr.bf16.mxu0 %v837_v24  ;;  %v849_v48 = vpack.c.bf16 %v36_v44, %v35_v43  ;;  %v38_v50 = vld [vmem:[%s1170_s2 + $0x68] sm:$0xff]  ;;  %v24_v51 = vld [vmem:[%s1169_s1 + $0x38] sm:$0xff]  ;;  %v39_v53 = vld [vmem:[%s1170_s2 + $0x70] sm:$0xff]  ;;  %v525_v43 = vshrl.u32 %v524_v22, 7 }
   0xe   :  { %810 = vmatprep.subr.bf16.mxu1 %v809_v15  ;;  %v853_v52 = vpack.c.bf16 %v38_v50, %v37_v49  ;;  %v40_v54 = vld [vmem:[%s1170_s2 + $0x78] sm:$0xff] }
   0xf   :  { %v857_v55 = vpack.c.bf16 %v40_v54, %v39_v53 }
  0x10   :  { %840 = vmatpush3.bf16.msra.mxu0 %v837_v24 }
  0x11   :  { %812 = vmatpush3.bf16.msra.mxu1 %v809_v15  ;;  %842 = vmatprep.subr.bf16.mxu0 %v841_v34 }
  0x12   :  { %814 = vmatprep.subr.bf16.mxu1 %v813_v23 }
  0x14   :  { %702 = vmatmul.mubr.msk.f32.vlgmr.msra.gmra.mrb[0].mxu1 %vm57_vm0, %v18_v29  ;;  %844 = vmatpush3.bf16.msra.mxu0 %v841_v34 }
  0x15   :  { %816 = vmatpush3.bf16.msra.mxu1 %v813_v23  ;;  %704 = vmatprep.mubr.msk.f32.mxu1 %vm57_vm0, %v19_v30 }
  0x16   :  { %818 = vmatprep.subr.bf16.mxu1 %v817_v31  ;;  %846 = vmatprep.subr.bf16.mxu0 %v845_v42 }
  0x18   :  { %705 = vmatmul.mubr.msk.f32.gmra.mrb[2].mxu1 %vm57_vm0, %v20_v37  ;;  %848 = vmatpush3.bf16.msra.mxu0 %v845_v42 }
  0x19   :  { %820 = vmatpush3.bf16.msra.mxu1 %v817_v31  ;;  %707 = vmatprep.mubr.msk.f32.mxu1 %vm57_vm0, %v21_v38 }
  0x1a   :  { %822 = vmatprep.subr.bf16.mxu1 %v821_v39  ;;  %850 = vmatprep.subr.bf16.mxu0 %v849_v48 }
  0x1c   :  { %708 = vmatmul.mubr.msk.f32.gmra.mrb[4].mxu1 %vm57_vm0, %v22_v45  ;;  %852 = vmatpush3.bf16.msra.mxu0 %v849_v48 }
  0x1d   :  { %824 = vmatpush3.bf16.msra.mxu1 %v821_v39  ;;  %710 = vmatprep.mubr.msk.f32.mxu1 %vm57_vm0, %v23_v46 }
  0x1e   :  { %826 = vmatprep.subr.bf16.mxu1 %v825_v47  ;;  %854 = vmatprep.subr.bf16.mxu0 %v853_v52 }
  0x20   :  { %711 = vmatmul.mubr.msk.f32.gmra.mrb[6].mxu1 %vm57_vm0, %v24_v51  ;;  %856 = vmatpush3.bf16.msra.mxu0 %v853_v52 }
  0x21   :  { %828 = vmatpush3.bf16.msra.mxu1 %v825_v47  ;;  %729 = vmatprep.mubr.msk.f32.mxu1 %vm57_vm0, %v939_v8  ;;  %v1061_v8 = vld [vmem:[%s1171_s3] ss:$0 sm:$0xff] }
  0x22   :  { %858 = vmatprep.subr.bf16.mxu0 %v857_v55 }
  0x24   :  { %730 = vmatmul.mubr.msk.f32.vlgmr.msra.gmra.mrb[8].mxu1 %vm57_vm0, %v18_v29  ;;  %860 = vmatpush3.bf16.msra.mxu0 %v857_v55  ;;  %v1069_v29 = vand.u32 127, %v524_v22 }
  0x25   :  { %732 = vmatprep.mubr.msk.f32.mxu1 %vm57_vm0, %v19_v30 }
  0x26   :  { %vm543_vm1 = vcmp.lt.s32.totalorder %v1069_v29, 1 }
  0x28   :  { %733 = vmatmul.mubr.msk.f32.gmra.mrb[10].mxu1 %vm57_vm0, %v20_v37 }
  0x29   :  { %735 = vmatprep.mubr.msk.f32.mxu1 %vm57_vm0, %v21_v38 }
  0x2c   :  { %736 = vmatmul.mubr.msk.f32.gmra.mrb[12].mxu1 %vm57_vm0, %v22_v45 }
  0x2d   :  { %738 = vmatprep.mubr.msk.f32.mxu1 %vm57_vm0, %v23_v46 }
  0x30   :  { %739 = vmatmul.mubr.msk.f32.gmra.mrb[14].mxu1 %vm57_vm0, %v24_v51 }
  0xe7   :  { %v703_v56 = vpop.f32.mrb[0].mxu1 }
  0xe8   :  { %v148_v57 = vpop.f32.mrb[1].mxu1 }
  0xe9   :  { %773 = vmatprep.mubr.f32.mxu0 %v148_v57 }
  0xea   :  { %774 = vmatmul.mubr.f32.vlgmr.msra.gmra.mrb[0].mxu0 %v703_v56 }
  0xeb   :  { %v706_v58 = vpop.f32.mrb[2].mxu1 }
  0xec   :  { %v158_v59 = vpop.f32.mrb[3].mxu1 }
  0xed   :  { %776 = vmatprep.mubr.f32.mxu0 %v158_v59 }
  0xee   :  { %777 = vmatmul.mubr.f32.gmra.mrb[2].mxu0 %v706_v58  ;;  %v532_v58 = vadd.s32 56, %v525_v43 }
  0xef   :  { %v709_v60 = vpop.f32.mrb[4].mxu1 }
  0xf0   :  { %v168_v61 = vpop.f32.mrb[5].mxu1  ;;  %vm542_vm2 = vcmp.lt.s32.totalorder %v532_v58, 57 }
  0xf1   :  { %779 = vmatprep.mubr.f32.mxu0 %v168_v61  ;;  %vm1109_vm3 = vmand %vm542_vm2, %vm543_vm1 }
  0xf2   :  { %780 = vmatmul.mubr.f32.gmra.mrb[4].mxu0 %v709_v60 }
  0xf3   :  { %v712_v62 = vpop.f32.mrb[6].mxu1 }
  0xf4   :  { %v178_v63 = vpop.f32.mrb[7].mxu1 }
  0xf5   :  { %782 = vmatprep.mubr.f32.mxu0 %v178_v63 }
  0xf6   :  { %783 = vmatmul.mubr.f32.gmra.mrb[6].mxu0 %v712_v62 }
  0xf7   :  { %v731_v0 = vpop.f32.mrb[8].mxu1 }
  0xf8   :  { %v253_v1 = vpop.f32.mrb[9].mxu1 }
  0xf9   :  { %785 = vmatprep.mubr.f32.mxu0 %v253_v1 }
  0xfa   :  { %786 = vmatmul.mubr.f32.gmra.mrb[8].mxu0 %v731_v0 }
  0xfb   :  { %v734_v2 = vpop.f32.mrb[10].mxu1 }
  0xfc   :  { %v263_v3 = vpop.f32.mrb[11].mxu1 }
  0xfd   :  { %788 = vmatprep.mubr.f32.mxu0 %v263_v3 }
  0xfe   :  { %789 = vmatmul.mubr.f32.gmra.mrb[10].mxu0 %v734_v2 }
  0xff   :  { %v737_v4 = vpop.f32.mrb[12].mxu1 }
 0x100   :  { %v273_v5 = vpop.f32.mrb[13].mxu1 }
 0x101   :  { %791 = vmatprep.mubr.f32.mxu0 %v273_v5 }
 0x102   :  { %792 = vmatmul.mubr.f32.gmra.mrb[12].mxu0 %v737_v4 }
 0x103   :  { %v740_v6 = vpop.f32.mrb[14].mxu1 }
 0x104   :  { %v283_v7 = vpop.f32.mrb[15].mxu1 }
 0x105   :  { %794 = vmatprep.mubr.f32.mxu0 %v283_v7 }
 0x106   :  { %795 = vmatmul.mubr.f32.gmra.mrb[14].mxu0 %v740_v6 }
 0x1bd   :  { %v775_v9 = vpop.f32.mrb[0].mxu0 }
 0x1be   :  { %v445_v10 = vadd.f32 %v775_v9, %v1061_v8  ;;  %v358_v11 = vpop.f32.mrb[1].mxu0 }
 0x1bf   :  { %v444_v12 = vadd.f32 %v1061_v8, %v358_v11 }
 0x1c0   :  { %v461_v13 = vmul.f32 0.5, %v445_v10 }
 0x1c1   :  { %v460_v14 = vmul.f32 0.5, %v444_v12  ;;  %v778_v15 = vpop.f32.mrb[2].mxu0 }
 0x1c2   :  { %861 = vtanh.f32 %v461_v13  ;;  %v447_v16 = vadd.f32 %v778_v15, %v1061_v8  ;;  %v368_v17 = vpop.f32.mrb[3].mxu0 }
 0x1c3   :  { %863 = vtanh.f32 %v460_v14  ;;  %v446_v18 = vadd.f32 %v1061_v8, %v368_v17 }
 0x1c4   :  { %v463_v19 = vmul.f32 0.5, %v447_v16 }
 0x1c5   :  { %v462_v20 = vmul.f32 0.5, %v446_v18  ;;  %v781_v21 = vpop.f32.mrb[4].mxu0 }
 0x1c6   :  { %865 = vtanh.f32 %v463_v19  ;;  %v449_v23 = vadd.f32 %v781_v21, %v1061_v8  ;;  %v378_v24 = vpop.f32.mrb[5].mxu0 }
 0x1c7   :  { %867 = vtanh.f32 %v462_v20  ;;  %v448_v25 = vadd.f32 %v1061_v8, %v378_v24 }
 0x1c8   :  { %v465_v26 = vmul.f32 0.5, %v449_v23 }
 0x1c9   :  { %v464_v27 = vmul.f32 0.5, %v448_v25  ;;  %v784_v28 = vpop.f32.mrb[6].mxu0 }
 0x1ca   :  { %869 = vtanh.f32 %v465_v26  ;;  %v451_v30 = vadd.f32 %v784_v28, %v1061_v8  ;;  %v388_v31 = vpop.f32.mrb[7].mxu0 }
 0x1cb   :  { %871 = vtanh.f32 %v464_v27  ;;  %v450_v32 = vadd.f32 %v1061_v8, %v388_v31 }
 0x1cc   :  { %v862_v33 = vpop.eup %861  ;;  %v467_v34 = vmul.f32 0.5, %v451_v30 }
 0x1cd   :  { %v864_v35 = vpop.eup %863  ;;  %v493_v36 = vmul.f32 0.5, %v862_v33  ;;  %v466_v37 = vmul.f32 0.5, %v450_v32  ;;  %v787_v38 = vpop.f32.mrb[8].mxu0 }
 0x1ce   :  { %v492_v39 = vmul.f32 0.5, %v864_v35  ;;  %873 = vtanh.f32 %v467_v34  ;;  %v453_v40 = vadd.f32 %v787_v38, %v1061_v8  ;;  %v398_v41 = vpop.f32.mrb[9].mxu0 }
 0x1cf   :  { %v509_v42 = vadd.f32 0.5, %v493_v36  ;;  %875 = vtanh.f32 %v466_v37  ;;  %v452_v44 = vadd.f32 %v1061_v8, %v398_v41 }
 0x1d0   :  { %v866_v45 = vpop.eup %865  ;;  %v508_v46 = vadd.f32 0.5, %v492_v39  ;;  %v469_v47 = vmul.f32 0.5, %v453_v40 }
 0x1d1   :  { %v868_v48 = vpop.eup %867  ;;  %v569_v49 = vsel %vm543_vm1, %v509_v42, 0.0  ;;  %v495_v50 = vmul.f32 0.5, %v866_v45  ;;  %v468_v51 = vmul.f32 0.5, %v452_v44  ;;  %v790_v52 = vpop.f32.mrb[10].mxu0 }
 0x1d2   :  { %585 = vst [vmem:[%s1172_s4 + $0x8] sm:$0xff] %v569_v49  ;;  %v568_v53 = vsel %vm543_vm1, %v508_v46, 0.0  ;;  %v494_v54 = vmul.f32 0.5, %v868_v48  ;;  %877 = vtanh.f32 %v469_v47  ;;  %v455_v55 = vadd.f32 %v790_v52, %v1061_v8  ;;  %v408_v56 = vpop.f32.mrb[11].mxu0 }
 0x1d3   :  { %584 = vst [vmem:[%s1172_s4] sm:$0xff] %v568_v53  ;;  %v511_v57 = vadd.f32 0.5, %v495_v50  ;;  %879 = vtanh.f32 %v468_v51  ;;  %v454_v59 = vadd.f32 %v1061_v8, %v408_v56 }
 0x1d4   :  { %v870_v60 = vpop.eup %869  ;;  %v510_v61 = vadd.f32 0.5, %v494_v54  ;;  %v471_v62 = vmul.f32 0.5, %v455_v55 }
 0x1d5   :  { %v872_v63 = vpop.eup %871  ;;  %v571_v0 = vsel %vm543_vm1, %v511_v57, 0.0  ;;  %v497_v1 = vmul.f32 0.5, %v870_v60  ;;  %v470_v2 = vmul.f32 0.5, %v454_v59  ;;  %v793_v3 = vpop.f32.mrb[12].mxu0 }
 0x1d6   :  { %587 = vst [vmem:[%s1172_s4 + $0x18] sm:$0xff] %v571_v0  ;;  %v570_v4 = vsel %vm543_vm1, %v510_v61, 0.0  ;;  %v496_v5 = vmul.f32 0.5, %v872_v63  ;;  %881 = vtanh.f32 %v471_v62  ;;  %v457_v6 = vadd.f32 %v793_v3, %v1061_v8  ;;  %v418_v7 = vpop.f32.mrb[13].mxu0 }
 0x1d7   :  { %586 = vst [vmem:[%s1172_s4 + $0x10] sm:$0xff] %v570_v4  ;;  %v513_v9 = vadd.f32 0.5, %v497_v1  ;;  %883 = vtanh.f32 %v470_v2  ;;  %v456_v10 = vadd.f32 %v1061_v8, %v418_v7 }
 0x1d8   :  { %v874_v11 = vpop.eup %873  ;;  %v512_v12 = vadd.f32 0.5, %v496_v5  ;;  %v473_v13 = vmul.f32 0.5, %v457_v6 }
 0x1d9   :  { %v876_v14 = vpop.eup %875  ;;  %v573_v15 = vsel %vm543_vm1, %v513_v9, 0.0  ;;  %v499_v16 = vmul.f32 0.5, %v874_v11  ;;  %v472_v17 = vmul.f32 0.5, %v456_v10  ;;  %v796_v18 = vpop.f32.mrb[14].mxu0 }
 0x1da   :  { %589 = vst [vmem:[%s1172_s4 + $0x28] sm:$0xff] %v573_v15  ;;  %v572_v19 = vsel %vm543_vm1, %v512_v12, 0.0  ;;  %v498_v21 = vmul.f32 0.5, %v876_v14  ;;  %885 = vtanh.f32 %v473_v13  ;;  %v459_v22 = vadd.f32 %v796_v18, %v1061_v8  ;;  %v428_v23 = vpop.f32.mrb[15].mxu0 }
 0x1db   :  { %588 = vst [vmem:[%s1172_s4 + $0x20] sm:$0xff] %v572_v19  ;;  %v515_v24 = vadd.f32 0.5, %v499_v16  ;;  %887 = vtanh.f32 %v472_v17  ;;  %v458_v25 = vadd.f32 %v1061_v8, %v428_v23 }
 0x1dc   :  { %v878_v26 = vpop.eup %877  ;;  %v514_v27 = vadd.f32 0.5, %v498_v21  ;;  %v475_v28 = vmul.f32 0.5, %v459_v22 }
 0x1dd   :  { %v880_v30 = vpop.eup %879  ;;  %v575_v31 = vsel %vm1109_vm3, %v515_v24, 0.0  ;;  %v501_v32 = vmul.f32 0.5, %v878_v26  ;;  %v474_v33 = vmul.f32 0.5, %v458_v25 }
 0x1de   :  { %591 = vst [vmem:[%s1172_s4 + $0x38] sm:$0xff] %v575_v31  ;;  %v574_v34 = vsel %vm543_vm1, %v514_v27, 0.0  ;;  %v500_v35 = vmul.f32 0.5, %v880_v30  ;;  %889 = vtanh.f32 %v475_v28 }
 0x1df   :  { %590 = vst [vmem:[%s1172_s4 + $0x30] sm:$0xff] %v574_v34  ;;  %v517_v8 = vadd.f32 0.5, %v501_v32  ;;  %891 = vtanh.f32 %v474_v33 }
 0x1e0   :  { %v882_v36 = vpop.eup %881  ;;  %v516_v37 = vadd.f32 0.5, %v500_v35 }
 0x1e1   :  { %v884_v38 = vpop.eup %883  ;;  %v577_v39 = vsel %vm543_vm1, %v517_v8, 0.0  ;;  %v503_v40 = vmul.f32 0.5, %v882_v36 }
 0x1e2   :  { %593 = vst [vmem:[%s1172_s4 + $0x48] sm:$0xff] %v577_v39  ;;  %v576_v41 = vsel %vm543_vm1, %v516_v37, 0.0  ;;  %v502_v42 = vmul.f32 0.5, %v884_v38 }
 0x1e3   :  { %592 = vst [vmem:[%s1172_s4 + $0x40] sm:$0xff] %v576_v41  ;;  %v519_v43 = vadd.f32 0.5, %v503_v40 }
 0x1e4   :  { %v886_v44 = vpop.eup %885  ;;  %v518_v45 = vadd.f32 0.5, %v502_v42 }
 0x1e5   :  { %v888_v46 = vpop.eup %887  ;;  %v579_v47 = vsel %vm543_vm1, %v519_v43, 0.0  ;;  %v505_v48 = vmul.f32 0.5, %v886_v44 }
 0x1e6   :  { %595 = vst [vmem:[%s1172_s4 + $0x58] sm:$0xff] %v579_v47  ;;  %v578_v49 = vsel %vm543_vm1, %v518_v45, 0.0  ;;  %v504_v50 = vmul.f32 0.5, %v888_v46 }
 0x1e7   :  { %594 = vst [vmem:[%s1172_s4 + $0x50] sm:$0xff] %v578_v49  ;;  %v521_v51 = vadd.f32 0.5, %v505_v48 }
 0x1e8   :  { %v890_v52 = vpop.eup %889  ;;  %v520_v53 = vadd.f32 0.5, %v504_v50 }
 0x1e9   :  { %v892_v54 = vpop.eup %891  ;;  %v581_v55 = vsel %vm543_vm1, %v521_v51, 0.0  ;;  %v507_v56 = vmul.f32 0.5, %v890_v52 }
 0x1ea   :  { %597 = vst [vmem:[%s1172_s4 + $0x68] sm:$0xff] %v581_v55  ;;  %v580_v57 = vsel %vm543_vm1, %v520_v53, 0.0  ;;  %v506_v58 = vmul.f32 0.5, %v892_v54 }
 0x1eb   :  { %596 = vst [vmem:[%s1172_s4 + $0x60] sm:$0xff] %v580_v57  ;;  %v523_v59 = vadd.f32 0.5, %v507_v56 }
 0x1ec   :  { %v522_v60 = vadd.f32 0.5, %v506_v58 }
 0x1ed   :  { %v583_v61 = vsel %vm1109_vm3, %v523_v59, 0.0 }
 0x1ee   :  { %599 = vst [vmem:[%s1172_s4 + $0x78] sm:$0xff] %v583_v61  ;;  %v582_v62 = vsel %vm543_vm1, %v522_v60, 0.0 }
 0x1ef   :  { %598 = vst [vmem:[%s1172_s4 + $0x70] sm:$0xff] %v582_v62 }

</bundles_post_ra>
